<compile_context>
chip_gen: v6e
topology: v6e:2x2x1
jax: 0.10.0
libtpu: 0.0.40
codegen_flags: <defaults>
</compile_context>

<pallas_src>
import functools

import jax
import jax.numpy as jnp
from jax.experimental import pallas as pl
from jax.experimental.pallas import tpu as pltpu

_EPS = 1e-5


def _round_up(x, m):
    return (x + m - 1) // m * m


# ----------------------------- fused conv GEMM (+BN/residual/ReLU) -----------------------------

def _gemm_epilogue(acc, s_ref, t_ref, r_ref, relu):
    # f32 epilogue: folded-BN scale/shift (+ residual) (+ ReLU).
    y = acc * s_ref[...] + t_ref[...]
    if r_ref is not None:
        y = y + r_ref[...].astype(jnp.float32)
    if relu:
        y = jnp.maximum(y, 0.0)
    return y


def _conv_gemm_kernel(a_ref, b_ref, s_ref, t_ref, o_ref, acc_ref, *, relu):
    k = pl.program_id(2)

    @pl.when(k == 0)
    def _():
        acc_ref[...] = jnp.zeros_like(acc_ref)

    acc_ref[...] += jnp.dot(a_ref[...], b_ref[...],
                            preferred_element_type=jnp.float32)

    @pl.when(k == pl.num_programs(2) - 1)
    def _():
        o_ref[...] = _gemm_epilogue(acc_ref[...], s_ref, t_ref, None, relu
                                    ).astype(o_ref.dtype)


def _conv_gemm_res_kernel(a_ref, b_ref, s_ref, t_ref, r_ref, o_ref, acc_ref, *, relu):
    k = pl.program_id(2)

    @pl.when(k == 0)
    def _():
        acc_ref[...] = jnp.zeros_like(acc_ref)

    acc_ref[...] += jnp.dot(a_ref[...], b_ref[...],
                            preferred_element_type=jnp.float32)

    @pl.when(k == pl.num_programs(2) - 1)
    def _():
        o_ref[...] = _gemm_epilogue(acc_ref[...], s_ref, t_ref, r_ref, relu
                                    ).astype(o_ref.dtype)


def _pick_tk(k_pad):
    """Largest K tile that is a multiple of 128, divides k_pad, and keeps VMEM small."""
    if k_pad <= 1280:
        return k_pad
    best = 128            # 128 always divides k_pad (k_pad is a multiple of 128)
    d = 256
    while d <= 1152:
        if k_pad % d == 0:
            best = d
        d += 128
    return best


def pallas_conv_gemm(a, b, scale, shift, residual=None, relu=True,
                     out_dtype=jnp.bfloat16):
    """a: (M, K) bf16 patches, b: (K, Cout) bf16 weights.
       Returns (M, Cout) out_dtype = act(BN(a @ b) [+ residual])."""
    M, K = a.shape
    K2, Cout = b.shape
    assert K == K2

    # K padding / tiling (zero padding contributes nothing to the dot).
    K_pad = _round_up(K, 128)
    if K_pad != K:
        a = jnp.pad(a, ((0, 0), (0, K_pad - K)))
        b = jnp.pad(b, ((0, K_pad - K), (0, 0)))
    tk = _pick_tk(K_pad)

    # Cout (N) tiling: whole if small, else 256-wide tiles (2nd parallel grid axis).
    if Cout <= 256:
        tn = Cout
    elif Cout % 256 == 0:
        tn = 256
    elif Cout % 128 == 0:
        tn = 128
    else:
        tn = Cout

    # M tiling: large tiles for the memory-bound early layers.
    tm = min(_round_up(M, 8), 512)
    M_pad = _round_up(M, tm)
    if M_pad != M:
        a = jnp.pad(a, ((0, M_pad - M), (0, 0)))
        if residual is not None:
            residual = jnp.pad(residual, ((0, M_pad - M), (0, 0)))

    s = scale.reshape(1, Cout).astype(jnp.float32)
    t = shift.reshape(1, Cout).astype(jnp.float32)

    grid = (M_pad // tm, Cout // tn, K_pad // tk)
    a_spec = pl.BlockSpec((tm, tk), lambda i, j, k: (i, k))
    b_spec = pl.BlockSpec((tk, tn), lambda i, j, k: (k, j))
    p_spec = pl.BlockSpec((1, tn), lambda i, j, k: (0, j))
    o_spec = pl.BlockSpec((tm, tn), lambda i, j, k: (i, j))

    if residual is None:
        kernel = functools.partial(_conv_gemm_kernel, relu=relu)
        in_specs = [a_spec, b_spec, p_spec, p_spec]
        args = (a, b, s, t)
    else:
        kernel = functools.partial(_conv_gemm_res_kernel, relu=relu)
        in_specs = [a_spec, b_spec, p_spec, p_spec, o_spec]
        args = (a, b, s, t, residual)

    out = pl.pallas_call(
        kernel,
        out_shape=jax.ShapeDtypeStruct((M_pad, Cout), out_dtype),
        grid=grid,
        in_specs=in_specs,
        out_specs=o_spec,
        scratch_shapes=[pltpu.VMEM((tm, tn), jnp.float32)],
        compiler_params=pltpu.CompilerParams(
            dimension_semantics=("parallel", "parallel", "arbitrary")),
    )(*args)
    return out[:M]


def conv_bn_act(x_nhwc, w_oihw, bn, *, stride, padding, residual=None, relu=True):
    """Conv2d (bias-free) + folded-BN (+ residual) (+ ReLU), via bf16 im2col + fused GEMM."""
    N, H, W, Cin = x_nhwc.shape
    Cout, Cin2, kh, kw = w_oihw.shape
    assert Cin == Cin2
    scale, shift = bn

    OH = (H + 2 * padding - kh) // stride + 1
    OW = (W + 2 * padding - kw) // stride + 1

    xp = x_nhwc.astype(jnp.bfloat16)   # bf16 patches: MXU-native, halves A-operand HBM bytes
    if padding:
        xp = jnp.pad(xp, ((0, 0), (padding, padding), (padding, padding), (0, 0)))

    cols = []
    for ky in range(kh):
        for kx in range(kw):
            cols.append(xp[:, ky:ky + stride * (OH - 1) + 1:stride,
                           kx:kx + stride * (OW - 1) + 1:stride, :])
    patches = cols[0] if len(cols) == 1 else jnp.concatenate(cols, axis=-1)
    a = patches.reshape(N * OH * OW, kh * kw * Cin)
    b = jnp.transpose(w_oihw, (2, 3, 1, 0)).reshape(kh * kw * Cin, Cout).astype(jnp.bfloat16)

    r2 = (residual.astype(jnp.bfloat16).reshape(N * OH * OW, Cout)
          if residual is not None else None)
    out = pallas_conv_gemm(a, b, scale, shift, residual=r2, relu=relu,
                           out_dtype=jnp.bfloat16)
    return out.reshape(N, OH, OW, Cout)


# ----------------------------- fused 3x3 / stride-2 / pad-1 max pool -----------------------------

def _maxpool_kernel(e0_ref, e1_ref, e2_ref, o0_ref, o1_ref, o2_ref, out_ref, *, ow):
    # Each e*/o* ref holds one padded input row, split into even / odd columns.
    em = jnp.maximum(jnp.maximum(e0_ref[0], e1_ref[0]), e2_ref[0])   # (We, C)
    om = jnp.maximum(jnp.maximum(o0_ref[0], o1_ref[0]), o2_ref[0])   # (Wo, C)
    # output col ow covers padded cols {2ow, 2ow+1, 2ow+2} = even[ow], odd[ow], even[ow+1]
    res = jnp.maximum(jnp.maximum(em[0:ow, :], om[0:ow, :]), em[1:ow + 1, :])
    out_ref[0] = res


def maxpool_3x3_s2_p1(x_nhwc):
    N, H, W, C = x_nhwc.shape
    neg = jnp.finfo(x_nhwc.dtype).min
    xp = jnp.pad(x_nhwc, ((0, 0), (1, 1), (1, 1), (0, 0)), constant_values=neg)
    Hp, Wp = H + 2, W + 2
    OH = (H + 2 - 3) // 2 + 1
    OW = (W + 2 - 3) // 2 + 1

    ev = xp[:, :, 0::2, :]                      # even padded columns
    od = xp[:, :, 1::2, :]                      # odd padded columns
    We, Wo = ev.shape[2], od.shape[2]
    ev2 = ev.reshape(N * Hp, We, C)
    od2 = od.reshape(N * Hp, Wo, C)

    def row_idx(ky):
        return lambda i: ((i // OH) * Hp + (i % OH) * 2 + ky, 0, 0)

    in_specs = ([pl.BlockSpec((1, We, C), row_idx(ky)) for ky in range(3)]
                + [pl.BlockSpec((1, Wo, C), row_idx(ky)) for ky in range(3)])

    out = pl.pallas_call(
        functools.partial(_maxpool_kernel, ow=OW),
        out_shape=jax.ShapeDtypeStruct((N * OH, OW, C), x_nhwc.dtype),
        grid=(N * OH,),
        in_specs=in_specs,
        out_specs=pl.BlockSpec((1, OW, C), lambda i: (i, 0, 0)),
        compiler_params=pltpu.CompilerParams(dimension_semantics=("parallel",)),
    )(ev2, ev2, ev2, od2, od2, od2)
    return out.reshape(N, OH, OW, C)


# ----------------------------- head: global-avg-pool + fc + sigmoid -----------------------------

def _head_kernel(x_ref, w_ref, b_ref, o_ref):
    hw = x_ref.shape[1]
    x = x_ref[...].astype(jnp.float32)                               # f32 accumulate
    feats = jnp.sum(x, axis=1) * (1.0 / hw)                          # (N, C)
    logits = jnp.sum(feats * w_ref[...], axis=-1, keepdims=True)     # (N, 1)
    logits = logits + b_ref[...]
    o_ref[...] = jax.nn.sigmoid(logits)


def pallas_head(x, w, b):
    """x: (N, HW, C); w: (1, C) (torch Linear weight layout (out,in)=(1,512)); b: (1,1)."""
    N, HW, C = x.shape
    return pl.pallas_call(
        _head_kernel,
        out_shape=jax.ShapeDtypeStruct((N, 1), jnp.float32),
        grid=(1,),
        in_specs=[pl.BlockSpec((N, HW, C), lambda i: (0, 0, 0)),
                  pl.BlockSpec((1, C), lambda i: (0, 0)),
                  pl.BlockSpec((1, 1), lambda i: (0, 0))],
        out_specs=pl.BlockSpec((N, 1), lambda i: (0, 0)),
    )(x, w, b)


# --------------------------- parameters (deterministic init) ---------------------------

def _fold_bn(gamma, beta, mean, var):
    scale = gamma / jnp.sqrt(var + _EPS)
    shift = beta - mean * scale
    return scale, shift


def _init_conv(key, cout, cin, kh, kw):
    fan_in = cin * kh * kw
    return (jax.random.normal(key, (cout, cin, kh, kw), jnp.float32)
            * (1.0 / jnp.sqrt(float(fan_in))))


def _init_bn(key, c):
    k1, k2, k3, k4 = jax.random.split(key, 4)
    gamma = 1.0 + 0.1 * jax.random.normal(k1, (c,), jnp.float32)
    beta = 0.1 * jax.random.normal(k2, (c,), jnp.float32)
    mean = 0.1 * jax.random.normal(k3, (c,), jnp.float32)
    var = 0.8 + 0.4 * jax.random.uniform(k4, (c,), jnp.float32)
    return _fold_bn(gamma, beta, mean, var)


def _init_block(key, cin, cout, stride):
    ks = jax.random.split(key, 6)
    p = {
        'conv1': _init_conv(ks[0], cout, cin, 3, 3),
        'bn1': _init_bn(ks[1], cout),
        'conv2': _init_conv(ks[2], cout, cout, 3, 3),
        'bn2': _init_bn(ks[3], cout),
        'stride': stride,
    }
    if stride != 1 or cin != cout:
        p['ds_conv'] = _init_conv(ks[4], cout, cin, 1, 1)
        p['ds_bn'] = _init_bn(ks[5], cout)
    return p


def init_discriminator_params(key):
    keys = jax.random.split(key, 16)
    params = {
        'conv1': _init_conv(keys[0], 64, 3, 7, 7),   # Conv2d(3, 64, 7, stride=2, padding=3)
        'bn1': _init_bn(keys[1], 64),
    }
    cfg = [(64, 64, 1), (64, 64, 1),        # layer1
           (64, 128, 2), (128, 128, 1),     # layer2
           (128, 256, 2), (256, 256, 1),    # layer3
           (256, 512, 2), (512, 512, 1)]    # layer4
    params['blocks'] = [_init_block(keys[2 + i], cin, cout, s)
                        for i, (cin, cout, s) in enumerate(cfg)]
    params['fc_w'] = (jax.random.normal(keys[10], (1, 512), jnp.float32)
                      * (1.0 / jnp.sqrt(512.0)))                    # torch Linear (out, in)
    params['fc_b'] = 0.02 * jax.random.normal(keys[11], (1, 1), jnp.float32)
    return params


# --------------------------- forward pass ---------------------------

def basic_block(x, p):
    stride = p['stride']
    if 'ds_conv' in p:
        identity = conv_bn_act(x, p['ds_conv'], p['ds_bn'],
                               stride=stride, padding=0, relu=False)
    else:
        identity = x
    out = conv_bn_act(x, p['conv1'], p['bn1'], stride=stride, padding=1, relu=True)
    # conv2 + bn2 + residual add + ReLU fused in one GEMM epilogue
    out = conv_bn_act(out, p['conv2'], p['bn2'], stride=1, padding=1,
                      residual=identity, relu=True)
    return out


def discriminator_forward(params, x_nchw):
    x = jnp.transpose(x_nchw, (0, 2, 3, 1))                          # NCHW -> NHWC
    x = conv_bn_act(x, params['conv1'], params['bn1'], stride=2, padding=3, relu=True)
    x = maxpool_3x3_s2_p1(x)
    for p in params['blocks']:
        x = basic_block(x, p)
    N, H, W, C = x.shape
    feats = x.reshape(N, H * W, C)                                  # (N, HW, 512) bf16
    return pallas_head(feats, params['fc_w'], params['fc_b'])       # sigmoid(fc(avgpool))


if __name__ == "__main__":
    params = init_discriminator_params(jax.random.PRNGKey(42))
    x = jax.random.normal(jax.random.PRNGKey(0), (2, 3, 64, 64), jnp.float32)
    out = discriminator_forward(params, x)
    out = jax.block_until_ready(out)
    assert out.shape == (2, 1)
    assert bool(jnp.all(jnp.isfinite(out)))
    assert bool(jnp.all((out >= 0.0) & (out <= 1.0)))
    print("KERNEL_OK")
</pallas_src>

<mosaic_0001>
module attributes {stable_mosaic.version = 11 : i64} {
  func.func @_conv_gemm_kernel(%arg0: i32, %arg1: i32, %arg2: i32, %arg3: memref<512x256xbf16, #tpu.memory_space<vmem>>, %arg4: memref<256x64xbf16, #tpu.memory_space<vmem>>, %arg5: memref<1x64xf32, #tpu.memory_space<vmem>>, %arg6: memref<1x64xf32, #tpu.memory_space<vmem>>, %arg7: memref<512x64xbf16, #tpu.memory_space<vmem>>, %arg8: memref<512x64xf32, #tpu.memory_space<vmem>>) attributes {dimension_semantics = [#tpu.dimension_semantics<parallel>, #tpu.dimension_semantics<parallel>, #tpu.dimension_semantics<arbitrary>], iteration_bounds = array<i64: 4, 1, 1>, scalar_prefetch = 0 : i64, scratch_operands = 1 : i64, tpu.core_type = #tpu.core_type<tc>, window_params = [{transform_indices = @transform_0, window_bounds = array<i64: 512, 256>}, {transform_indices = @transform_1, window_bounds = array<i64: 256, 64>}, {transform_indices = @transform_2, window_bounds = array<i64: 1, 64>}, {transform_indices = @transform_3, window_bounds = array<i64: 1, 64>}, {transform_indices = @transform_4, window_bounds = array<i64: 512, 64>}]} {
    %c0_i32 = arith.constant 0 : i32
    %0 = arith.cmpi eq, %arg2, %c0_i32 : i32
    %1 = arith.extui %0 : i1 to i32
    %c0_i32_0 = arith.constant 0 : i32
    %2 = arith.cmpi ne, %1, %c0_i32_0 : i32
    scf.if %2 {
      %cst_10 = arith.constant 0.000000e+00 : f32
      %12 = vector.broadcast %cst_10 : f32 to vector<512x64xf32>
      %c0_11 = arith.constant 0 : index
      %c0_12 = arith.constant 0 : index
      %13 = vector.load %arg8[%c0_11, %c0_12] : memref<512x64xf32, #tpu.memory_space<vmem>>, vector<512x64xf32>
      tpu.vector_store %arg8[%c0_11, %c0_12], %12 {strides = array<i32>} : memref<512x64xf32, #tpu.memory_space<vmem>>, vector<512x64xf32>,
    } else {
    }
    %c0 = arith.constant 0 : index
    %c0_1 = arith.constant 0 : index
    %3 = vector.load %arg8[%c0, %c0_1] : memref<512x64xf32, #tpu.memory_space<vmem>>, vector<512x64xf32>
    %c0_2 = arith.constant 0 : index
    %c0_3 = arith.constant 0 : index
    %4 = vector.load %arg3[%c0_2, %c0_3] : memref<512x256xbf16, #tpu.memory_space<vmem>>, vector<512x256xbf16>
    %c0_4 = arith.constant 0 : index
    %c0_5 = arith.constant 0 : index
    %5 = vector.load %arg4[%c0_4, %c0_5] : memref<256x64xbf16, #tpu.memory_space<vmem>>, vector<256x64xbf16>
    %cst = arith.constant dense<0.000000e+00> : vector<512x64xf32>
    %6 = tpu.matmul %4, %5, %cst {dimension_numbers = #tpu.dot_dimension_numbers<[1], [0], [0], [1], [0, 0, 1, 1], [], []>} : vector<512x256xbf16>, vector<256x64xbf16>, vector<512x64xf32> -> vector<512x64xf32>
    %7 = arith.addf %3, %6 : vector<512x64xf32>
    %c0_6 = arith.constant 0 : index
    %c0_7 = arith.constant 0 : index
    %8 = vector.load %arg8[%c0_6, %c0_7] : memref<512x64xf32, #tpu.memory_space<vmem>>, vector<512x64xf32>
    tpu.vector_store %arg8[%c0_6, %c0_7], %7 {strides = array<i32>} : memref<512x64xf32, #tpu.memory_space<vmem>>, vector<512x64xf32>,
    %c0_i32_8 = arith.constant 0 : i32
    %9 = arith.cmpi eq, %arg2, %c0_i32_8 : i32
    %10 = arith.extui %9 : i1 to i32
    %c0_i32_9 = arith.constant 0 : i32
    %11 = arith.cmpi ne, %10, %c0_i32_9 : i32
    scf.if %11 {
      %c0_10 = arith.constant 0 : index
      %c0_11 = arith.constant 0 : index
      %12 = vector.load %arg8[%c0_10, %c0_11] : memref<512x64xf32, #tpu.memory_space<vmem>>, vector<512x64xf32>
      %c0_12 = arith.constant 0 : index
      %c0_13 = arith.constant 0 : index
      %13 = vector.load %arg5[%c0_12, %c0_13] : memref<1x64xf32, #tpu.memory_space<vmem>>, vector<1x64xf32>
      %14 = vector.broadcast %13 : vector<1x64xf32> to vector<512x64xf32>
      %15 = arith.mulf %12, %14 : vector<512x64xf32>
      %c0_14 = arith.constant 0 : index
      %c0_15 = arith.constant 0 : index
      %16 = vector.load %arg6[%c0_14, %c0_15] : memref<1x64xf32, #tpu.memory_space<vmem>>, vector<1x64xf32>
      %17 = vector.broadcast %16 : vector<1x64xf32> to vector<512x64xf32>
      %18 = arith.addf %15, %17 : vector<512x64xf32>
      %cst_16 = arith.constant 0.000000e+00 : f32
      %19 = vector.broadcast %cst_16 : f32 to vector<512x64xf32>
      %20 = arith.maximumf %18, %19 : vector<512x64xf32>
      %21 = arith.truncf %20 : vector<512x64xf32> to vector<512x64xbf16>
      %c0_17 = arith.constant 0 : index
      %c0_18 = arith.constant 0 : index
      %22 = vector.load %arg7[%c0_17, %c0_18] : memref<512x64xbf16, #tpu.memory_space<vmem>>, vector<512x64xbf16>
      tpu.vector_store %arg7[%c0_17, %c0_18], %21 {strides = array<i32>} : memref<512x64xbf16, #tpu.memory_space<vmem>>, vector<512x64xbf16>,
    } else {
    }
    return
  }
  func.func @transform_0(%arg0: i32, %arg1: i32, %arg2: i32) -> (i32, i32) {
    %c0_i32 = arith.constant 0 : i32
    return %arg0, %arg2 : i32, i32
  }
  func.func @transform_1(%arg0: i32, %arg1: i32, %arg2: i32) -> (i32, i32) {
    %c0_i32 = arith.constant 0 : i32
    return %arg2, %arg1 : i32, i32
  }
  func.func @transform_2(%arg0: i32, %arg1: i32, %arg2: i32) -> (i32, i32) {
    %c0_i32 = arith.constant 0 : i32
    %c0_i32_0 = arith.constant 0 : i32
    return %c0_i32, %arg1 : i32, i32
  }
  func.func @transform_3(%arg0: i32, %arg1: i32, %arg2: i32) -> (i32, i32) {
    %c0_i32 = arith.constant 0 : i32
    %c0_i32_0 = arith.constant 0 : i32
    return %c0_i32, %arg1 : i32, i32
  }
  func.func @transform_4(%arg0: i32, %arg1: i32, %arg2: i32) -> (i32, i32) {
    %c0_i32 = arith.constant 0 : i32
    return %arg0, %arg1 : i32, i32
  }
}

</mosaic_0001>

<bundles_post_ra>
// kernel: tpu_custom_call.1
= control target key start
LH: loop header
LB: loop body
LE: loop exit
PB: predicated region body
PF: predicated region fallthrough
CT: control target
= control target key end

     0   :  { %9 = vsyncpa [#allocation4], 0  ;;  %s3368_s0 = inlined_call_operand.hbm [shape: bf16[2048,256], index: 0, kind: input, shape index: {}]   ;;  %s3369_s1 = inlined_call_operand.vmem [shape: bf16[256,64], index: 1, kind: input, shape index: {}]   ;;  %s3370_s2 = inlined_call_operand.vmem [shape: f32[1,64], index: 2, kind: input, shape index: {}]   ;;  %s3371_s3 = inlined_call_operand.vmem [shape: f32[1,64], index: 3, kind: input, shape index: {}]   ;;  %s3372_s4 = inlined_call_operand.vmem [shape: bf16[2048,64], index: 4, kind: output, shape index: {}]  }
   0x1   :  { %11 = vsyncpa [#allocation4 + $0x1], 0  ;;  %s2650_s15 = smov 0   ;;  %s2652_s16 = smov 0  }
   0x2   :  { %s2654_s17 = smov 0   ;;  %s2656_s18 = smov 0  }
   0x3   :  { %s2658_s19 = smov 0   ;;  %s2660_s20 = smov 0  }
   0x4 LB: > { %s2106_s21 = sadd.s32 4294967295, %s2618_s20   ;;  %s36_s22 = sadd.s32 1, %s2614_s19  ;;  %s2618_s20 = sphi %s2660_s20, %s17_s20   ;;  %s2614_s19 = sphi %s2658_s19, %s3380_s19   ;;  %s2610_s18 = sphi %s2656_s18, %s3379_s18   ;;  %s2606_s17 = sphi %s2654_s17, %s3378_s17   ;;  %s2602_s16 = sphi %s2652_s16, %s3377_s16   ;;  %s2598_s15 = sphi %s2650_s15, %s3376_s15  }
   0x5   : > { %p38_p0 = scmp.ge.s32.totalorder %s36_s22, 4  ;;  %s45_s23 = sadd.s32 1, %s2606_s17 }
   0x6   : > { %p52_p1 = scmp.ne.s32.totalorder %s2606_s17, %s2602_s16  ;;  %p53_p2 = scmp.eq.s32.totalorder %s2618_s20, 0 }
   0x7   : > { %s3382_s22 = smov (%p38_p0, %s36_s22), 0  ;;  %p58_p4 = scmp.ne.s32.totalorder %s2602_s16, %s2598_s15 }
   0x8   : > { %p2686_p3 = por %p53_p2, %p52_p1  ;;  %s40_s25 = ssub.s32 %s2614_s19, %s3382_s22 }
   0x9   : > { %p59_p5 = scmp.eq.s32.totalorder %s2106_s21, 0  ;;  %p43_p6 = scmp.eq.s32.totalorder %s40_s25, 0 }
   0xa   : > { %p2373_p8 = scmp.lt.s32.totalorder %s2618_s20, 4  ;;  %s214_s28 = sand.u32 1, %s2606_s17  }
   0xb   : > { %p2693_p7 = por %p59_p5, %p58_p4  ;;  %s2270_s29 = sshll.u32 %s2614_s19, 13 }
   0xc   : > { %s2699_s27 = scalar_select %p43_p6, %s2606_s17, %s45_s23  }
   0xd   : > { %s2113_s30 = sshll.u32 %s214_s28, 9  ;;  %s227_s7 = scalar_lea.hbm %s3368_s0, %s2270_s29 }
   0xe   : > { %s218_s8 = scalar_lea.vmem [#allocation3], %s2113_s30  ;;  %p2708_p9 = pnand %p2373_p8, %p2686_p3 }
   0xf   : > { %s228_s9 = sshll.u32 %s218_s8, 4  ;;  %s215_s11 = scalar_lea.sflag [#allocation4], %s214_s28  ;;  %s229_s9 = int_to_ptr.vmem [resolvable:$true] %s228_s9 }
  0x10   : > { %p2542_p10 = pneg %p2708_p9  ;;  %s2553_s12 = scalar_lea.vmem %s229_s9, 8192 }
  0x11   : > { %p2554_p11 = scmp.ne.s32.totalorder %s229_s9, %s2553_s12  ;;  %s2620_s13 = smov [#allocation3]  }
  0x12   : > { %s2558_s14 = sshll.u32 %s2620_s13, 4  ;;  %s2559_s14 = int_to_ptr.vmem [resolvable:$false] %s2558_s14 }
  0x13   : > { %p2556_p12 = pnand %p2554_p11, %p2542_p10  ;;  %s2560_s15 = scalar_lea.vmem %s2559_s14, 16384 }
  0x14   : > { %p2561_p0 = scmp.lt.s32.totalorder %s229_s9, %s2559_s14  ;;  %p2562_p1 = scmp.lt.s32.totalorder %s2560_s15, %s2553_s12 }
  0x15   : > { %p2557_p13 = pneg %p2556_p12 }
  0x16   : > { %p2563_p2 = por %p2562_p1, %p2561_p0 }
  0x18   : > { %p2564_p3 = pnand %p2563_p2, %p2557_p13 }
  0x1a   : > { %2567 = shalt.err (!%p2564_p3)
}
  0x1b   : > { %s2621_s21 = smov 128   ;;  %s2622_s23 = smov 8  }
  0x1c   : > { %2372 = dma.hbm_to_vmem [thread:$0]  (!%p2708_p9), %s227_s7, 8192, %s229_s9, %s215_s11, %s2621_s21, %s2621_s21, %s2622_s23  }
  0x1d   : > { %p2117_p4 = scmp.ge.s32.totalorder %s2618_s20, 1  ;;  %p236_p5 = scmp.lt.s32.totalorder %s2618_s20, 5 }
  0x1f   : > { %p237_p6 = pnand %p2117_p4, %p236_p5 }
  0x20   : > { %s242_s24 = sand.u32 (!%p237_p6), 1, %s2602_s16  }
  0x21   : > { %240 = sbr.rel (%p237_p6) target bundleno = 441 (0x1b9), region = 36  ;;  %s2118_s25 = sshll.u32 (!%p237_p6), %s242_s24, 9 }
  0x22   : > { %s243_s28 = scalar_lea.sflag (!%p237_p6), [#allocation4], %s242_s24  ;;  %s2719_s29 = scalar_lea.vmem (!%p237_p6), [#allocation3], %s2118_s25 }
  0x26   : > { %2593 = dma.done.wait (%p2693_p7), %s243_s28, 8192  }
  0x27   : > { %2595 = vsyncadd (%p2693_p7), %s243_s28, 4294959104  ;;  %v2623_v0 = vmov 0   ;;  %v2426_v1 = vld [vmem:[%s3369_s1 + $0x38] sm:$0xff]   ;;  %v2427_v2 = vld [vmem:[%s3369_s1 + $0x30] sm:$0xff]   ;;  %vm319_vm0 = vcmask 523264   ;;  %v2624_v19 = vmov 0.0  }
  0x28   : > { %960 = vmatprep.subr.bf16.mxu0 %v2623_v0  ;;  %2335 = vmatprep.subr.bf16.mxu1 %v2623_v0  ;;  %v2428_v3 = vld [vmem:[%s3369_s1 + $0x28] sm:$0xff]   ;;  %v2429_v4 = vld [vmem:[%s3369_s1 + $0x20] sm:$0xff]   ;;  %v2430_v5 = vld [vmem:[%s3369_s1 + $0x18] sm:$0xff]   ;;  %320 = vst.msk [vmem:[#allocation2] sm:$0xff] %vm319_vm0, %v2624_v19  ;;  %s2119_s23 = sshll.u32 %s2610_s18, 6  ;;  %vm1907_vm1 = vcmask 519168  }
  0x29   : > { %961 = vmatpush1.bf16.msra.mxu0 %v2426_v1  ;;  %2351 = vmatpush1.bf16.msra.mxu1 %v2426_v1  ;;  %v2444_v6 = vld [vmem:[%s2719_s29 + $0x4] ss:$8 sps:$4 sm:$0xff]   ;;  %v2431_v7 = vld [vmem:[%s3369_s1 + $0x10] sm:$0xff]   ;;  %v2434_v11 = vld [vmem:[%s3369_s1 + $0x78] sm:$0xff]   ;;  %321 = vst.msk [vmem:[#allocation2 + $0x8] sm:$0xff] %vm319_vm0, %v2624_v19  ;;  %p306_p7 = scmp.lt.s32.totalorder %s2119_s23, 255 }
  0x2a   : > { %962 = vmatprep.subr.bf16.mxu0 %v2623_v0  ;;  %2336 = vmatprep.subr.bf16.mxu1 %v2623_v0  ;;  %v2447_v8 = vld [vmem:[%s2719_s29 + $0x104] ss:$8 sps:$4 sm:$0xff]   ;;  %v2435_v12 = vld [vmem:[%s3369_s1 + $0x70] sm:$0xff]   ;;  %v2438_v15 = vld [vmem:[%s3369_s1 + $0x58] sm:$0xff]   ;;  %322 = vst.msk [vmem:[#allocation2 + $0x10] sm:$0xff] %vm319_vm0, %v2624_v19 }
  0x2b   : > { %992 = vmatprep.mubr.bf16.mxu0 %v2444_v6  ;;  %1120 = vmatprep.mubr.bf16.mxu1 %v2447_v8  ;;  %v2432_v9 = vld [vmem:[%s3369_s1 + $0x8] sm:$0xff]   ;;  %v2433_v10 = vld [vmem:[%s3369_s1] sm:$0xff]   ;;  %v2439_v16 = vld [vmem:[%s3369_s1 + $0x50] sm:$0xff]   ;;  %323 = vst.msk [vmem:[#allocation2 + $0x18] sm:$0xff] %vm319_vm0, %v2624_v19  ;;  %s3384_s23 = smov (!%p306_p7, %s2119_s23), 255 }
  0x2c   : > { %v2436_v13 = vld [vmem:[%s3369_s1 + $0x68] sm:$0xff]   ;;  %v2437_v14 = vld [vmem:[%s3369_s1 + $0x60] sm:$0xff]   ;;  %324 = vst.msk [vmem:[#allocation2 + $0x20] sm:$0xff] %vm319_vm0, %v2624_v19  ;;  %325 = vst.msk [vmem:[#allocation2 + $0x28] sm:$0xff] %vm319_vm0, %v2624_v19  ;;  %s2120_s28 = sshll.u32 %s3384_s23, 2 }
  0x2d   : > { %963 = vmatpush1.bf16.msra.mxu0 %v2427_v2  ;;  %2352 = vmatpush1.bf16.msra.mxu1 %v2427_v2  ;;  %v2440_v17 = vld [vmem:[%s3369_s1 + $0x48] sm:$0xff]   ;;  %v2805_v18 = vld [vmem:[%s3369_s1 + $0x40] sm:$0xff]   ;;  %326 = vst.msk [vmem:[#allocation2 + $0x30] sm:$0xff] %vm319_vm0, %v2624_v19  ;;  %327 = vst.msk [vmem:[#allocation2 + $0x38] sm:$0xff] %vm319_vm0, %v2624_v19  ;;  %s3032_s6 = scalar_lea.vmem %s3372_s4, %s2120_s28 }
  0x2e   : > { %964 = vmatprep.subr.bf16.mxu0 %v2623_v0  ;;  %2337 = vmatprep.subr.bf16.mxu1 %v2623_v0  ;;  %328 = vst.msk [vmem:[#allocation2 + $0x40] sm:$0xff] %vm319_vm0, %v2624_v19  ;;  %329 = vst.msk [vmem:[#allocation2 + $0x48] sm:$0xff] %vm319_vm0, %v2624_v19  ;;  %v2442_v20 = vld [vmem:[%s2719_s29] ss:$8 sps:$4 sm:$0xff]   ;;  %v2448_v22 = vld [vmem:[%s2719_s29 + $0x14] ss:$8 sps:$4 sm:$0xff]  }
  0x2f   : > { %330 = vst.msk [vmem:[#allocation2 + $0x50] sm:$0xff] %vm319_vm0, %v2624_v19  ;;  %331 = vst.msk [vmem:[#allocation2 + $0x58] sm:$0xff] %vm319_vm0, %v2624_v19  ;;  %v2445_v21 = vld [vmem:[%s2719_s29 + $0x100] ss:$8 sps:$4 sm:$0xff]   ;;  %v2450_v23 = vld [vmem:[%s2719_s29 + $0x114] ss:$8 sps:$4 sm:$0xff]  }
  0x30   : > { %332 = vst.msk [vmem:[#allocation2 + $0x60] sm:$0xff] %vm319_vm0, %v2624_v19  ;;  %333 = vst.msk [vmem:[#allocation2 + $0x68] sm:$0xff] %vm319_vm0, %v2624_v19  ;;  %v2452_v24 = vld [vmem:[%s2719_s29 + $0x10] ss:$8 sps:$4 sm:$0xff]   ;;  %v2454_v26 = vld [vmem:[%s2719_s29 + $0x24] ss:$8 sps:$4 sm:$0xff]  }
  0x31   : > { %965 = vmatpush1.bf16.msra.mxu0 %v2428_v3  ;;  %2353 = vmatpush1.bf16.msra.mxu1 %v2428_v3  ;;  %334 = vst.msk [vmem:[#allocation2 + $0x70] sm:$0xff] %vm319_vm0, %v2624_v19  ;;  %335 = vst.msk [vmem:[#allocation2 + $0x78] sm:$0xff] %vm319_vm0, %v2624_v19  ;;  %v2453_v25 = vld [vmem:[%s2719_s29 + $0x110] ss:$8 sps:$4 sm:$0xff]   ;;  %v2456_v27 = vld [vmem:[%s2719_s29 + $0x124] ss:$8 sps:$4 sm:$0xff]  }
  0x32   : > { %966 = vmatprep.subr.bf16.mxu0 %v2623_v0  ;;  %2338 = vmatprep.subr.bf16.mxu1 %v2623_v0  ;;  %336 = vst.msk [vmem:[#allocation2 + $0x80] sm:$0xff] %vm319_vm0, %v2624_v19  ;;  %337 = vst.msk [vmem:[#allocation2 + $0x88] sm:$0xff] %vm319_vm0, %v2624_v19  ;;  %v2458_v28 = vld [vmem:[%s2719_s29 + $0x20] ss:$8 sps:$4 sm:$0xff]   ;;  %v2460_v30 = vld [vmem:[%s2719_s29 + $0x34] ss:$8 sps:$4 sm:$0xff]  }
  0x33   : > { %338 = vst.msk [vmem:[#allocation2 + $0x90] sm:$0xff] %vm319_vm0, %v2624_v19  ;;  %339 = vst.msk [vmem:[#allocation2 + $0x98] sm:$0xff] %vm319_vm0, %v2624_v19  ;;  %v2459_v29 = vld [vmem:[%s2719_s29 + $0x120] ss:$8 sps:$4 sm:$0xff]   ;;  %v2462_v31 = vld [vmem:[%s2719_s29 + $0x134] ss:$8 sps:$4 sm:$0xff]  }
  0x34   : > { %340 = vst.msk [vmem:[#allocation2 + $0xa0] sm:$0xff] %vm319_vm0, %v2624_v19  ;;  %341 = vst.msk [vmem:[#allocation2 + $0xa8] sm:$0xff] %vm319_vm0, %v2624_v19  ;;  %v2464_v32 = vld [vmem:[%s2719_s29 + $0x30] ss:$8 sps:$4 sm:$0xff]   ;;  %v2466_v34 = vld [vmem:[%s2719_s29 + $0x44] ss:$8 sps:$4 sm:$0xff]  }
  0x35   : > { %967 = vmatpush1.bf16.msra.mxu0 %v2429_v4  ;;  %2354 = vmatpush1.bf16.msra.mxu1 %v2429_v4  ;;  %342 = vst.msk [vmem:[#allocation2 + $0xb0] sm:$0xff] %vm319_vm0, %v2624_v19  ;;  %343 = vst.msk [vmem:[#allocation2 + $0xb8] sm:$0xff] %vm319_vm0, %v2624_v19  ;;  %v2465_v33 = vld [vmem:[%s2719_s29 + $0x130] ss:$8 sps:$4 sm:$0xff]   ;;  %v2468_v35 = vld [vmem:[%s2719_s29 + $0x144] ss:$8 sps:$4 sm:$0xff]  }
  0x36   : > { %968 = vmatprep.subr.bf16.mxu0 %v2623_v0  ;;  %2339 = vmatprep.subr.bf16.mxu1 %v2623_v0  ;;  %344 = vst.msk [vmem:[#allocation2 + $0xc0] sm:$0xff] %vm319_vm0, %v2624_v19  ;;  %345 = vst.msk [vmem:[#allocation2 + $0xc8] sm:$0xff] %vm319_vm0, %v2624_v19  ;;  %v2470_v36 = vld [vmem:[%s2719_s29 + $0x40] ss:$8 sps:$4 sm:$0xff]   ;;  %v2472_v38 = vld [vmem:[%s2719_s29 + $0x54] ss:$8 sps:$4 sm:$0xff]  }
  0x37   : > { %346 = vst.msk [vmem:[#allocation2 + $0xd0] sm:$0xff] %vm319_vm0, %v2624_v19  ;;  %347 = vst.msk [vmem:[#allocation2 + $0xd8] sm:$0xff] %vm319_vm0, %v2624_v19  ;;  %v2471_v37 = vld [vmem:[%s2719_s29 + $0x140] ss:$8 sps:$4 sm:$0xff]   ;;  %v2474_v39 = vld [vmem:[%s2719_s29 + $0x154] ss:$8 sps:$4 sm:$0xff]  }
  0x38   : > { %348 = vst.msk [vmem:[#allocation2 + $0xe0] sm:$0xff] %vm319_vm0, %v2624_v19  ;;  %349 = vst.msk [vmem:[#allocation2 + $0xe8] sm:$0xff] %vm319_vm0, %v2624_v19  ;;  %v2476_v40 = vld [vmem:[%s2719_s29 + $0x50] ss:$8 sps:$4 sm:$0xff]   ;;  %v2478_v42 = vld [vmem:[%s2719_s29 + $0x64] ss:$8 sps:$4 sm:$0xff]  }
  0x39   : > { %969 = vmatpush1.bf16.msra.mxu0 %v2430_v5  ;;  %2355 = vmatpush1.bf16.msra.mxu1 %v2430_v5  ;;  %350 = vst.msk [vmem:[#allocation2 + $0xf0] sm:$0xff] %vm319_vm0, %v2624_v19  ;;  %351 = vst.msk [vmem:[#allocation2 + $0xf8] sm:$0xff] %vm319_vm0, %v2624_v19  ;;  %v2477_v41 = vld [vmem:[%s2719_s29 + $0x150] ss:$8 sps:$4 sm:$0xff]   ;;  %v2480_v43 = vld [vmem:[%s2719_s29 + $0x164] ss:$8 sps:$4 sm:$0xff]  }
  0x3a   : > { %970 = vmatprep.subr.bf16.mxu0 %v2623_v0  ;;  %2340 = vmatprep.subr.bf16.mxu1 %v2623_v0  ;;  %352 = vst.msk [vmem:[#allocation2 + $0x100] sm:$0xff] %vm319_vm0, %v2624_v19  ;;  %353 = vst.msk [vmem:[#allocation2 + $0x108] sm:$0xff] %vm319_vm0, %v2624_v19  ;;  %v2482_v44 = vld [vmem:[%s2719_s29 + $0x60] ss:$8 sps:$4 sm:$0xff]   ;;  %v2484_v46 = vld [vmem:[%s2719_s29 + $0x74] ss:$8 sps:$4 sm:$0xff]  }
  0x3b   : > { %354 = vst.msk [vmem:[#allocation2 + $0x110] sm:$0xff] %vm319_vm0, %v2624_v19  ;;  %355 = vst.msk [vmem:[#allocation2 + $0x118] sm:$0xff] %vm319_vm0, %v2624_v19  ;;  %v2483_v45 = vld [vmem:[%s2719_s29 + $0x160] ss:$8 sps:$4 sm:$0xff]   ;;  %v2486_v47 = vld [vmem:[%s2719_s29 + $0x174] ss:$8 sps:$4 sm:$0xff]  }
  0x3c   : > { %356 = vst.msk [vmem:[#allocation2 + $0x120] sm:$0xff] %vm319_vm0, %v2624_v19  ;;  %357 = vst.msk [vmem:[#allocation2 + $0x128] sm:$0xff] %vm319_vm0, %v2624_v19  ;;  %v2488_v48 = vld [vmem:[%s2719_s29 + $0x70] ss:$8 sps:$4 sm:$0xff]   ;;  %v2490_v50 = vld [vmem:[%s2719_s29 + $0x84] ss:$8 sps:$4 sm:$0xff]  }
  0x3d   : > { %971 = vmatpush1.bf16.msra.mxu0 %v2431_v7  ;;  %2356 = vmatpush1.bf16.msra.mxu1 %v2431_v7  ;;  %358 = vst.msk [vmem:[#allocation2 + $0x130] sm:$0xff] %vm319_vm0, %v2624_v19  ;;  %359 = vst.msk [vmem:[#allocation2 + $0x138] sm:$0xff] %vm319_vm0, %v2624_v19  ;;  %v2489_v49 = vld [vmem:[%s2719_s29 + $0x170] ss:$8 sps:$4 sm:$0xff]   ;;  %v2492_v51 = vld [vmem:[%s2719_s29 + $0x184] ss:$8 sps:$4 sm:$0xff]  }
  0x3e   : > { %972 = vmatprep.subr.bf16.mxu0 %v2623_v0  ;;  %2341 = vmatprep.subr.bf16.mxu1 %v2623_v0  ;;  %360 = vst.msk [vmem:[#allocation2 + $0x140] sm:$0xff] %vm319_vm0, %v2624_v19  ;;  %361 = vst.msk [vmem:[#allocation2 + $0x148] sm:$0xff] %vm319_vm0, %v2624_v19  ;;  %v2494_v52 = vld [vmem:[%s2719_s29 + $0x80] ss:$8 sps:$4 sm:$0xff]   ;;  %v2496_v54 = vld [vmem:[%s2719_s29 + $0x94] ss:$8 sps:$4 sm:$0xff]  }
  0x3f   : > { %362 = vst.msk [vmem:[#allocation2 + $0x150] sm:$0xff] %vm319_vm0, %v2624_v19  ;;  %363 = vst.msk [vmem:[#allocation2 + $0x158] sm:$0xff] %vm319_vm0, %v2624_v19  ;;  %v2495_v53 = vld [vmem:[%s2719_s29 + $0x180] ss:$8 sps:$4 sm:$0xff]   ;;  %v2498_v55 = vld [vmem:[%s2719_s29 + $0x194] ss:$8 sps:$4 sm:$0xff]  }
  0x40   : > { %364 = vst.msk [vmem:[#allocation2 + $0x160] sm:$0xff] %vm319_vm0, %v2624_v19  ;;  %365 = vst.msk [vmem:[#allocation2 + $0x168] sm:$0xff] %vm319_vm0, %v2624_v19  ;;  %v2500_v56 = vld [vmem:[%s2719_s29 + $0x90] ss:$8 sps:$4 sm:$0xff]   ;;  %v2502_v58 = vld [vmem:[%s2719_s29 + $0xa4] ss:$8 sps:$4 sm:$0xff]  }
  0x41   : > { %973 = vmatpush1.bf16.msra.mxu0 %v2432_v9  ;;  %2357 = vmatpush1.bf16.msra.mxu1 %v2432_v9  ;;  %366 = vst.msk [vmem:[#allocation2 + $0x170] sm:$0xff] %vm319_vm0, %v2624_v19  ;;  %367 = vst.msk [vmem:[#allocation2 + $0x178] sm:$0xff] %vm319_vm0, %v2624_v19  ;;  %v2501_v57 = vld [vmem:[%s2719_s29 + $0x190] ss:$8 sps:$4 sm:$0xff]   ;;  %v2504_v59 = vld [vmem:[%s2719_s29 + $0x1a4] ss:$8 sps:$4 sm:$0xff]  }
  0x42   : > { %974 = vmatprep.subr.bf16.mxu0 %v2623_v0  ;;  %2342 = vmatprep.subr.bf16.mxu1 %v2623_v0  ;;  %368 = vst.msk [vmem:[#allocation2 + $0x180] sm:$0xff] %vm319_vm0, %v2624_v19  ;;  %369 = vst.msk [vmem:[#allocation2 + $0x188] sm:$0xff] %vm319_vm0, %v2624_v19  ;;  %v2506_v60 = vld [vmem:[%s2719_s29 + $0xa0] ss:$8 sps:$4 sm:$0xff]   ;;  %v2508_v62 = vld [vmem:[%s2719_s29 + $0xb4] ss:$8 sps:$4 sm:$0xff]  }
  0x43   : > { %370 = vst.msk [vmem:[#allocation2 + $0x190] sm:$0xff] %vm319_vm0, %v2624_v19  ;;  %371 = vst.msk [vmem:[#allocation2 + $0x198] sm:$0xff] %vm319_vm0, %v2624_v19  ;;  %v2507_v61 = vld [vmem:[%s2719_s29 + $0x1a0] ss:$8 sps:$4 sm:$0xff]   ;;  %v2510_v63 = vld [vmem:[%s2719_s29 + $0x1b4] ss:$8 sps:$4 sm:$0xff]  }
  0x44   : > { %372 = vst.msk [vmem:[#allocation2 + $0x1a0] sm:$0xff] %vm319_vm0, %v2624_v19  ;;  %373 = vst.msk [vmem:[#allocation2 + $0x1a8] sm:$0xff] %vm319_vm0, %v2624_v19  ;;  %v2513_v1 = vld [vmem:[%s2719_s29 + $0x1b0] ss:$8 sps:$4 sm:$0xff]   ;;  %v2514_v2 = vld [vmem:[%s2719_s29 + $0xc4] ss:$8 sps:$4 sm:$0xff]  }
  0x45   : > { %975 = vmatpush1.bf16.msra.mxu0 %v2433_v10  ;;  %2358 = vmatpush1.bf16.msra.mxu1 %v2433_v10  ;;  %374 = vst.msk [vmem:[#allocation2 + $0x1b0] sm:$0xff] %vm319_vm0, %v2624_v19  ;;  %375 = vst.msk [vmem:[#allocation2 + $0x1b8] sm:$0xff] %vm319_vm0, %v2624_v19  ;;  %v2516_v3 = vld [vmem:[%s2719_s29 + $0x1c4] ss:$8 sps:$4 sm:$0xff]   ;;  %v2518_v4 = vld [vmem:[%s2719_s29 + $0xc0] ss:$8 sps:$4 sm:$0xff]  }
  0x46   : > { %976 = vmatprep.subr.bf16.mxu0 %v2623_v0  ;;  %2343 = vmatprep.subr.bf16.mxu1 %v2623_v0  ;;  %376 = vst.msk [vmem:[#allocation2 + $0x1c0] sm:$0xff] %vm319_vm0, %v2624_v19  ;;  %377 = vst.msk [vmem:[#allocation2 + $0x1c8] sm:$0xff] %vm319_vm0, %v2624_v19  ;;  %v2519_v5 = vld [vmem:[%s2719_s29 + $0x1c0] ss:$8 sps:$4 sm:$0xff]   ;;  %v2520_v6 = vld [vmem:[%s2719_s29 + $0xd4] ss:$8 sps:$4 sm:$0xff]  }
  0x47   : > { %378 = vst.msk [vmem:[#allocation2 + $0x1d0] sm:$0xff] %vm319_vm0, %v2624_v19  ;;  %379 = vst.msk [vmem:[#allocation2 + $0x1d8] sm:$0xff] %vm319_vm0, %v2624_v19  ;;  %v2522_v7 = vld [vmem:[%s2719_s29 + $0x1d4] ss:$8 sps:$4 sm:$0xff]   ;;  %v2524_v8 = vld [vmem:[%s2719_s29 + $0xd0] ss:$8 sps:$4 sm:$0xff]  }
  0x48   : > { %380 = vst.msk [vmem:[#allocation2 + $0x1e0] sm:$0xff] %vm319_vm0, %v2624_v19  ;;  %381 = vst.msk [vmem:[#allocation2 + $0x1e8] sm:$0xff] %vm319_vm0, %v2624_v19  ;;  %v2525_v9 = vld [vmem:[%s2719_s29 + $0x1d0] ss:$8 sps:$4 sm:$0xff]   ;;  %v2526_v10 = vld [vmem:[%s2719_s29 + $0xe4] ss:$8 sps:$4 sm:$0xff]  }
  0x49   : > { %977 = vmatpush2.bf16.msra.mxu0 %v2434_v11  ;;  %2359 = vmatpush2.bf16.msra.mxu1 %v2434_v11  ;;  %382 = vst.msk [vmem:[#allocation2 + $0x1f0] sm:$0xff] %vm319_vm0, %v2624_v19  ;;  %383 = vst.msk [vmem:[#allocation2 + $0x1f8] sm:$0xff] %vm319_vm0, %v2624_v19  ;;  %v2528_v11 = vld [vmem:[%s2719_s29 + $0x1e4] ss:$8 sps:$4 sm:$0xff]  }
  0x4a   : > { %978 = vmatprep.subr.bf16.mxu0 %v2623_v0  ;;  %2344 = vmatprep.subr.bf16.mxu1 %v2623_v0  ;;  %v416_v19 = vld [vmem:[#allocation2 + $0x100] sm:$0xff] }
  0x4d   : > { %979 = vmatpush2.bf16.msra.mxu0 %v2435_v12  ;;  %2360 = vmatpush2.bf16.msra.mxu1 %v2435_v12  ;;  %v2530_v12 = vld [vmem:[%s2719_s29 + $0xe0] ss:$8 sps:$4 sm:$0xff]  }
  0x4e   : > { %980 = vmatprep.subr.bf16.mxu0 %v2623_v0  ;;  %2345 = vmatprep.subr.bf16.mxu1 %v2623_v0 }
  0x51   : > { %981 = vmatpush2.bf16.msra.mxu0 %v2436_v13  ;;  %2361 = vmatpush2.bf16.msra.mxu1 %v2436_v13  ;;  %v2531_v13 = vld [vmem:[%s2719_s29 + $0x1e0] ss:$8 sps:$4 sm:$0xff]  }
  0x52   : > { %982 = vmatprep.subr.bf16.mxu0 %v2623_v0  ;;  %2346 = vmatprep.subr.bf16.mxu1 %v2623_v0 }
  0x55   : > { %983 = vmatpush2.bf16.msra.mxu0 %v2437_v14  ;;  %2362 = vmatpush2.bf16.msra.mxu1 %v2437_v14  ;;  %v2532_v14 = vld [vmem:[%s2719_s29 + $0xf4] ss:$8 sps:$4 sm:$0xff]  }
  0x56   : > { %984 = vmatprep.subr.bf16.mxu0 %v2623_v0  ;;  %2347 = vmatprep.subr.bf16.mxu1 %v2623_v0 }
  0x59   : > { %985 = vmatpush2.bf16.msra.mxu0 %v2438_v15  ;;  %2363 = vmatpush2.bf16.msra.mxu1 %v2438_v15  ;;  %v2534_v15 = vld [vmem:[%s2719_s29 + $0x1f4] ss:$8 sps:$4 sm:$0xff]  }
  0x5a   : > { %986 = vmatprep.subr.bf16.mxu0 %v2623_v0  ;;  %2348 = vmatprep.subr.bf16.mxu1 %v2623_v0 }
  0x5d   : > { %987 = vmatpush2.bf16.msra.mxu0 %v2439_v16  ;;  %2364 = vmatpush2.bf16.msra.mxu1 %v2439_v16  ;;  %v2536_v16 = vld [vmem:[%s2719_s29 + $0xf0] ss:$8 sps:$4 sm:$0xff]  }
  0x5e   : > { %988 = vmatprep.subr.bf16.mxu0 %v2623_v0  ;;  %2349 = vmatprep.subr.bf16.mxu1 %v2623_v0 }
  0x61   : > { %989 = vmatpush2.bf16.msra.mxu0 %v2440_v17  ;;  %2365 = vmatpush2.bf16.msra.mxu1 %v2440_v17  ;;  %v2537_v17 = vld [vmem:[%s2719_s29 + $0x1f0] ss:$8 sps:$4 sm:$0xff]  }
  0x62   : > { %990 = vmatprep.subr.bf16.mxu0 %v2623_v0  ;;  %2350 = vmatprep.subr.bf16.mxu1 %v2623_v0  ;;  %v2512_v0 = vld [vmem:[%s2719_s29 + $0xb0] ss:$8 sps:$4 sm:$0xff]  }
  0x65   : > { %991 = vmatpush2.bf16.msra.mxu0 %v2805_v18  ;;  %2366 = vmatpush2.bf16.msra.mxu1 %v2805_v18  ;;  %v384_v18 = vld [vmem:[#allocation2] sm:$0xff] }
  0x68   : > { %993 = vmatmul.mubr.bf16.vlgmr.msra.gmra.mxu0 %v2442_v20  ;;  %1121 = vmatmul.mubr.bf16.vlgmr.msra.gmra.mxu1 %v2445_v21 }
  0x69   : > { %1000 = vmatprep.mubr.bf16.mxu0 %v2448_v22  ;;  %1128 = vmatprep.mubr.bf16.mxu1 %v2450_v23 }
  0x70   : > { %1001 = vmatmul.mubr.bf16.gmra.mxu0 %v2452_v24  ;;  %1129 = vmatmul.mubr.bf16.gmra.mxu1 %v2453_v25 }
  0x71   : > { %1008 = vmatprep.mubr.bf16.mxu0 %v2454_v26  ;;  %1136 = vmatprep.mubr.bf16.mxu1 %v2456_v27  ;;  %v385_v26 = vld [vmem:[#allocation2 + $0x8] sm:$0xff] }
  0x72   : > { %v417_v27 = vld [vmem:[#allocation2 + $0x108] sm:$0xff] }
  0x78   : > { %1009 = vmatmul.mubr.bf16.gmra.mxu0 %v2458_v28  ;;  %1137 = vmatmul.mubr.bf16.gmra.mxu1 %v2459_v29 }
  0x79   : > { %1016 = vmatprep.mubr.bf16.mxu0 %v2460_v30  ;;  %1144 = vmatprep.mubr.bf16.mxu1 %v2462_v31 }
  0x80   : > { %1017 = vmatmul.mubr.bf16.gmra.mxu0 %v2464_v32  ;;  %1145 = vmatmul.mubr.bf16.gmra.mxu1 %v2465_v33 }
  0x81   : > { %1024 = vmatprep.mubr.bf16.mxu0 %v2466_v34  ;;  %1152 = vmatprep.mubr.bf16.mxu1 %v2468_v35  ;;  %v386_v34 = vld [vmem:[#allocation2 + $0x10] sm:$0xff] }
  0x82   : > { %v418_v35 = vld [vmem:[#allocation2 + $0x110] sm:$0xff] }
  0x88   : > { %1025 = vmatmul.mubr.bf16.gmra.mxu0 %v2470_v36  ;;  %1153 = vmatmul.mubr.bf16.gmra.mxu1 %v2471_v37  ;;  %v3009_v36 = vld [vmem:[%s3370_s2] ss:$0 sm:$0xff] }
  0x89   : > { %1032 = vmatprep.mubr.bf16.mxu0 %v2472_v38  ;;  %1160 = vmatprep.mubr.bf16.mxu1 %v2474_v39  ;;  %v3016_v39 = vld [vmem:[%s3371_s3] ss:$0 sm:$0xff] }
  0x90   : > { %1033 = vmatmul.mubr.bf16.gmra.mxu0 %v2476_v40  ;;  %1161 = vmatmul.mubr.bf16.gmra.mxu1 %v2477_v41 }
  0x91   : > { %1040 = vmatprep.mubr.bf16.mxu0 %v2478_v42  ;;  %1168 = vmatprep.mubr.bf16.mxu1 %v2480_v43  ;;  %v387_v42 = vld [vmem:[#allocation2 + $0x18] sm:$0xff] }
  0x98   : > { %1041 = vmatmul.mubr.bf16.gmra.mxu0 %v2482_v44  ;;  %1169 = vmatmul.mubr.bf16.gmra.mxu1 %v2483_v45 }
  0x99   : > { %1048 = vmatprep.mubr.bf16.mxu0 %v2484_v46  ;;  %1176 = vmatprep.mubr.bf16.mxu1 %v2486_v47  ;;  %v419_v47 = vld [vmem:[#allocation2 + $0x118] sm:$0xff] }
  0xa0   : > { %1049 = vmatmul.mubr.bf16.gmra.mxu0 %v2488_v48  ;;  %1177 = vmatmul.mubr.bf16.gmra.mxu1 %v2489_v49 }
  0xa1   : > { %1056 = vmatprep.mubr.bf16.mxu0 %v2490_v50  ;;  %1184 = vmatprep.mubr.bf16.mxu1 %v2492_v51 }
  0xa8   : > { %1057 = vmatmul.mubr.bf16.gmra.mxu0 %v2494_v52  ;;  %1185 = vmatmul.mubr.bf16.gmra.mxu1 %v2495_v53 }
  0xa9   : > { %1064 = vmatprep.mubr.bf16.mxu0 %v2496_v54  ;;  %1192 = vmatprep.mubr.bf16.mxu1 %v2498_v55 }
  0xb0   : > { %1065 = vmatmul.mubr.bf16.gmra.mxu0 %v2500_v56  ;;  %1193 = vmatmul.mubr.bf16.gmra.mxu1 %v2501_v57 }
  0xb1   : > { %1072 = vmatprep.mubr.bf16.mxu0 %v2502_v58  ;;  %1200 = vmatprep.mubr.bf16.mxu1 %v2504_v59 }
  0xb8   : > { %1073 = vmatmul.mubr.bf16.gmra.mxu0 %v2506_v60  ;;  %1201 = vmatmul.mubr.bf16.gmra.mxu1 %v2507_v61 }
  0xb9   : > { %1080 = vmatprep.mubr.bf16.mxu0 %v2508_v62  ;;  %1208 = vmatprep.mubr.bf16.mxu1 %v2510_v63 }
  0xc0   : > { %1081 = vmatmul.mubr.bf16.gmra.mxu0 %v2512_v0  ;;  %1209 = vmatmul.mubr.bf16.gmra.mxu1 %v2513_v1  ;;  %v388_v0 = vld [vmem:[#allocation2 + $0x20] sm:$0xff] }
  0xc1   : > { %1088 = vmatprep.mubr.bf16.mxu0 %v2514_v2  ;;  %1216 = vmatprep.mubr.bf16.mxu1 %v2516_v3  ;;  %v420_v1 = vld [vmem:[#allocation2 + $0x120] sm:$0xff] }
  0xc8   : > { %1089 = vmatmul.mubr.bf16.gmra.mxu0 %v2518_v4  ;;  %1217 = vmatmul.mubr.bf16.gmra.mxu1 %v2519_v5 }
  0xc9   : > { %1096 = vmatprep.mubr.bf16.mxu0 %v2520_v6  ;;  %1224 = vmatprep.mubr.bf16.mxu1 %v2522_v7 }
  0xd0   : > { %1097 = vmatmul.mubr.bf16.gmra.mxu0 %v2524_v8  ;;  %1225 = vmatmul.mubr.bf16.gmra.mxu1 %v2525_v9 }
  0xd1   : > { %1104 = vmatprep.mubr.bf16.mxu0 %v2526_v10  ;;  %1232 = vmatprep.mubr.bf16.mxu1 %v2528_v11 }
  0xd8   : > { %1105 = vmatmul.mubr.bf16.gmra.mxu0 %v2530_v12  ;;  %1233 = vmatmul.mubr.bf16.gmra.mxu1 %v2531_v13 }
  0xd9   : > { %1112 = vmatprep.mubr.bf16.mxu0 %v2532_v14  ;;  %1240 = vmatprep.mubr.bf16.mxu1 %v2534_v15 }
  0xe0   : > { %1113 = vmatmul.mubr.bf16.gmra.mxu0 %v2536_v16  ;;  %1241 = vmatmul.mubr.bf16.gmra.mxu1 %v2537_v17 }
 0x128   : > { %v994_v20 = vpop.f32.mrf.mxu0  ;;  %v1122_v21 = vpop.f32.mrf.mxu1 }
 0x129   : > { %v1249_v22 = vadd.f32 %v994_v20, %v384_v18  ;;  %v1281_v23 = vadd.f32 %v1122_v21, %v416_v19  ;;  %v389_v18 = vld [vmem:[#allocation2 + $0x28] sm:$0xff] }
 0x12a   : > { %v996_v24 = vpop.f32.mrf.mxu0  ;;  %v1124_v25 = vpop.f32.mrf.mxu1  ;;  %v421_v19 = vld [vmem:[#allocation2 + $0x128] sm:$0xff] }
 0x12b   : > { %1314 = vst.msk [vmem:[#allocation2] sm:$0xff] %vm319_vm0, %v1249_v22  ;;  %1346 = vst.msk [vmem:[#allocation2 + $0x100] sm:$0xff] %vm319_vm0, %v1281_v23 }
 0x12c   : > { %v997_v28 = vpop.f32.mrf.mxu0  ;;  %v1125_v29 = vpop.f32.mrf.mxu1 }
 0x12d   : > { %v1250_v30 = vadd.f32 %v997_v28, %v385_v26  ;;  %v1282_v31 = vadd.f32 %v1125_v29, %v417_v27 }
 0x12e   : > { %v999_v32 = vpop.f32.mrf.mxu0  ;;  %v1127_v33 = vpop.f32.mrf.mxu1 }
 0x12f   : > { %1315 = vst.msk [vmem:[#allocation2 + $0x8] sm:$0xff] %vm319_vm0, %v1250_v30  ;;  %1347 = vst.msk [vmem:[#allocation2 + $0x108] sm:$0xff] %vm319_vm0, %v1282_v31 }
 0x130   : > { %v1002_v37 = vpop.f32.mrf.mxu0  ;;  %v1130_v38 = vpop.f32.mrf.mxu1 }
 0x131   : > { %v1251_v40 = vadd.f32 %v1002_v37, %v386_v34  ;;  %v1283_v41 = vadd.f32 %v1130_v38, %v418_v35  ;;  %v390_v37 = vld [vmem:[#allocation2 + $0x30] sm:$0xff] }
 0x132   : > { %v1381_v43 = vld [vmem:[#allocation2] sm:$0xff]  ;;  %v1004_v45 = vpop.f32.mrf.mxu0  ;;  %v1132_v46 = vpop.f32.mrf.mxu1  ;;  %v422_v38 = vld [vmem:[#allocation2 + $0x130] sm:$0xff] }
 0x133   : > { %v1413_v44 = vld [vmem:[#allocation2 + $0x100] sm:$0xff]  ;;  %v1452_v48 = vmul.f32 %v3009_v36, %v1381_v43  ;;  %1316 = vst.msk [vmem:[#allocation2 + $0x10] sm:$0xff] %vm319_vm0, %v1251_v40  ;;  %1348 = vst.msk [vmem:[#allocation2 + $0x110] sm:$0xff] %vm319_vm0, %v1283_v41 }
 0x134   : > { %v1484_v49 = vmul.f32 %v3009_v36, %v1413_v44  ;;  %v1005_v50 = vpop.f32.mrf.mxu0  ;;  %v1133_v51 = vpop.f32.mrf.mxu1 }
 0x135   : > { %v1523_v52 = vadd.f32 %v3016_v39, %v1452_v48  ;;  %v1252_v54 = vadd.f32 %v1005_v50, %v387_v42  ;;  %v1284_v55 = vadd.f32 %v1133_v51, %v419_v47  ;;  %v391_v50 = vld [vmem:[#allocation2 + $0x38] sm:$0xff] }
 0x136   : > { %v1555_v53 = vadd.f32 %v3016_v39, %v1484_v49  ;;  %v1382_v56 = vld [vmem:[#allocation2 + $0x8] sm:$0xff]  ;;  %v1007_v58 = vpop.f32.mrf.mxu0  ;;  %v1135_v59 = vpop.f32.mrf.mxu1  ;;  %v423_v51 = vld [vmem:[#allocation2 + $0x138] sm:$0xff] }
 0x137   : > { %v1414_v57 = vld [vmem:[#allocation2 + $0x108] sm:$0xff]  ;;  %v1587_v60 = vmax.f32 %v1523_v52, 0.0  ;;  %v1453_v62 = vmul.f32 %v3009_v36, %v1382_v56  ;;  %1317 = vst.msk [vmem:[#allocation2 + $0x18] sm:$0xff] %vm319_vm0, %v1252_v54  ;;  %1349 = vst.msk [vmem:[#allocation2 + $0x118] sm:$0xff] %vm319_vm0, %v1284_v55 }
 0x138   : > { %v1619_v61 = vmax.f32 %v1555_v53, 0.0  ;;  %v1485_v63 = vmul.f32 %v3009_v36, %v1414_v57  ;;  %v1010_v2 = vpop.f32.mrf.mxu0  ;;  %v1138_v3 = vpop.f32.mrf.mxu1 }
 0x139   : > { %v2271_v4 = vpack.c.bf16 %v1587_v60, %v1587_v60  ;;  %v1524_v6 = vadd.f32 %v3016_v39, %v1453_v62  ;;  %v1253_v10 = vadd.f32 %v1010_v2, %v388_v0  ;;  %v1285_v11 = vadd.f32 %v1138_v3, %v420_v1 }
 0x13a   : > { %v2303_v5 = vpack.c.bf16 %v1619_v61, %v1619_v61  ;;  %v1556_v7 = vadd.f32 %v3016_v39, %v1485_v63  ;;  %v1383_v8 = vld [vmem:[#allocation2 + $0x10] sm:$0xff]  ;;  %v1012_v12 = vpop.f32.mrf.mxu0  ;;  %v1140_v13 = vpop.f32.mrf.mxu1 }
 0x13b   : > { %v1415_v9 = vld [vmem:[#allocation2 + $0x110] sm:$0xff]  ;;  %1908 = vst.msk [vmem:[%s3032_s6] sm:$0xf] %vm1907_vm1, %v2271_v4  ;;  %v1588_v14 = vmax.f32 %v1524_v6, 0.0  ;;  %v1454_v16 = vmul.f32 %v3009_v36, %v1383_v8  ;;  %v392_v4 = vld [vmem:[#allocation2 + $0x40] sm:$0xff] }
 0x13c   : > { %1940 = vst.msk [vmem:[%s3032_s6 + $0x80] sm:$0xf] %vm1907_vm1, %v2303_v5  ;;  %v1620_v15 = vmax.f32 %v1556_v7, 0.0  ;;  %v1486_v17 = vmul.f32 %v3009_v36, %v1415_v9  ;;  %v1013_v20 = vpop.f32.mrf.mxu0  ;;  %v1141_v21 = vpop.f32.mrf.mxu1  ;;  %v424_v5 = vld [vmem:[#allocation2 + $0x140] sm:$0xff] }
 0x13d   : > { %1318 = vst.msk [vmem:[#allocation2 + $0x20] sm:$0xff] %vm319_vm0, %v1253_v10  ;;  %1350 = vst.msk [vmem:[#allocation2 + $0x120] sm:$0xff] %vm319_vm0, %v1285_v11  ;;  %v2272_v22 = vpack.c.bf16 %v1588_v14, %v1588_v14  ;;  %v1525_v24 = vadd.f32 %v3016_v39, %v1454_v16  ;;  %v1254_v28 = vadd.f32 %v1013_v20, %v389_v18 }
 0x13e   : > { %v2304_v23 = vpack.c.bf16 %v1620_v15, %v1620_v15  ;;  %v1557_v25 = vadd.f32 %v3016_v39, %v1486_v17  ;;  %v1384_v26 = vld [vmem:[#allocation2 + $0x18] sm:$0xff]  ;;  %v1286_v29 = vadd.f32 %v1141_v21, %v421_v19  ;;  %v1015_v30 = vpop.f32.mrf.mxu0  ;;  %v1143_v31 = vpop.f32.mrf.mxu1 }
 0x13f   : > { %v1416_v27 = vld [vmem:[#allocation2 + $0x118] sm:$0xff]  ;;  %1909 = vst.msk [vmem:[%s3032_s6 + $0x4] sm:$0xf] %vm1907_vm1, %v2272_v22  ;;  %v1589_v32 = vmax.f32 %v1525_v24, 0.0  ;;  %v1455_v34 = vmul.f32 %v3009_v36, %v1384_v26  ;;  %v393_v22 = vld [vmem:[#allocation2 + $0x48] sm:$0xff] }
 0x140   : > { %1941 = vst.msk [vmem:[%s3032_s6 + $0x84] sm:$0xf] %vm1907_vm1, %v2304_v23  ;;  %v1621_v33 = vmax.f32 %v1557_v25, 0.0  ;;  %v1487_v35 = vmul.f32 %v3009_v36, %v1416_v27  ;;  %v1018_v40 = vpop.f32.mrf.mxu0  ;;  %v1146_v41 = vpop.f32.mrf.mxu1  ;;  %v425_v23 = vld [vmem:[#allocation2 + $0x148] sm:$0xff] }
 0x141   : > { %1319 = vst.msk [vmem:[#allocation2 + $0x28] sm:$0xff] %vm319_vm0, %v1254_v28  ;;  %1351 = vst.msk [vmem:[#allocation2 + $0x128] sm:$0xff] %vm319_vm0, %v1286_v29  ;;  %v2273_v42 = vpack.c.bf16 %v1589_v32, %v1589_v32  ;;  %v1526_v44 = vadd.f32 %v3016_v39, %v1455_v34  ;;  %v1255_v46 = vadd.f32 %v1018_v40, %v390_v37  ;;  %v394_v34 = vld [vmem:[#allocation2 + $0x50] sm:$0xff] }
 0x142   : > { %v2305_v43 = vpack.c.bf16 %v1621_v33, %v1621_v33  ;;  %v1558_v45 = vadd.f32 %v3016_v39, %v1487_v35  ;;  %v1287_v47 = vadd.f32 %v1146_v41, %v422_v38  ;;  %v1020_v48 = vpop.f32.mrf.mxu0  ;;  %v1148_v49 = vpop.f32.mrf.mxu1 }
 0x143   : > { %1910 = vst.msk [vmem:[%s3032_s6 + $0x8] sm:$0xf] %vm1907_vm1, %v2273_v42  ;;  %v1590_v52 = vmax.f32 %v1526_v44, 0.0 }
 0x144   : > { %1942 = vst.msk [vmem:[%s3032_s6 + $0x88] sm:$0xf] %vm1907_vm1, %v2305_v43  ;;  %v1622_v53 = vmax.f32 %v1558_v45, 0.0  ;;  %v1385_v54 = vld [vmem:[#allocation2 + $0x20] sm:$0xff]  ;;  %v1021_v58 = vpop.f32.mrf.mxu0  ;;  %v1149_v59 = vpop.f32.mrf.mxu1  ;;  %v426_v45 = vld [vmem:[#allocation2 + $0x150] sm:$0xff] }
 0x145   : > { %v1417_v55 = vld [vmem:[#allocation2 + $0x120] sm:$0xff]  ;;  %v1456_v56 = vmul.f32 %v3009_v36, %v1385_v54  ;;  %1320 = vst.msk [vmem:[#allocation2 + $0x30] sm:$0xff] %vm319_vm0, %v1255_v46  ;;  %1352 = vst.msk [vmem:[#allocation2 + $0x130] sm:$0xff] %vm319_vm0, %v1287_v47  ;;  %v2274_v60 = vpack.c.bf16 %v1590_v52, %v1590_v52  ;;  %v1256_v62 = vadd.f32 %v1021_v58, %v391_v50 }
 0x146   : > { %v1488_v57 = vmul.f32 %v3009_v36, %v1417_v55  ;;  %v2306_v61 = vpack.c.bf16 %v1622_v53, %v1622_v53  ;;  %v1288_v63 = vadd.f32 %v1149_v59, %v423_v51  ;;  %v1023_v2 = vpop.f32.mrf.mxu0  ;;  %v1151_v3 = vpop.f32.mrf.mxu1 }
 0x147   : > { %v1527_v0 = vadd.f32 %v3016_v39, %v1456_v56  ;;  %1911 = vst.msk [vmem:[%s3032_s6 + $0xc] sm:$0xf] %vm1907_vm1, %v2274_v60  ;;  %v395_v2 = vld [vmem:[#allocation2 + $0x58] sm:$0xff] }
 0x148   : > { %v1559_v1 = vadd.f32 %v3016_v39, %v1488_v57  ;;  %1943 = vst.msk [vmem:[%s3032_s6 + $0x8c] sm:$0xf] %vm1907_vm1, %v2306_v61  ;;  %v1386_v6 = vld [vmem:[#allocation2 + $0x28] sm:$0xff]  ;;  %v1026_v12 = vpop.f32.mrf.mxu0  ;;  %v1154_v13 = vpop.f32.mrf.mxu1  ;;  %v427_v3 = vld [vmem:[#allocation2 + $0x158] sm:$0xff] }
 0x149   : > { %v1418_v7 = vld [vmem:[#allocation2 + $0x128] sm:$0xff]  ;;  %1321 = vst.msk [vmem:[#allocation2 + $0x38] sm:$0xff] %vm319_vm0, %v1256_v62  ;;  %1353 = vst.msk [vmem:[#allocation2 + $0x138] sm:$0xff] %vm319_vm0, %v1288_v63  ;;  %v1591_v8 = vmax.f32 %v1527_v0, 0.0  ;;  %v1457_v10 = vmul.f32 %v3009_v36, %v1386_v6  ;;  %v1257_v14 = vadd.f32 %v1026_v12, %v392_v4  ;;  %v1289_v15 = vadd.f32 %v1154_v13, %v424_v5 }
 0x14a   : > { %v1623_v9 = vmax.f32 %v1559_v1, 0.0  ;;  %v1489_v11 = vmul.f32 %v3009_v36, %v1418_v7  ;;  %v1028_v20 = vpop.f32.mrf.mxu0  ;;  %v1156_v21 = vpop.f32.mrf.mxu1 }
 0x14b   : > { %v2275_v16 = vpack.c.bf16 %v1591_v8, %v1591_v8  ;;  %v1528_v18 = vadd.f32 %v3016_v39, %v1457_v10  ;;  %1322 = vst.msk [vmem:[#allocation2 + $0x40] sm:$0xff] %vm319_vm0, %v1257_v14  ;;  %1354 = vst.msk [vmem:[#allocation2 + $0x140] sm:$0xff] %vm319_vm0, %v1289_v15  ;;  %v396_v20 = vld [vmem:[#allocation2 + $0x60] sm:$0xff] }
 0x14c   : > { %v2307_v17 = vpack.c.bf16 %v1623_v9, %v1623_v9  ;;  %v1560_v19 = vadd.f32 %v3016_v39, %v1489_v11  ;;  %v1387_v24 = vld [vmem:[#allocation2 + $0x30] sm:$0xff]  ;;  %v1029_v30 = vpop.f32.mrf.mxu0  ;;  %v1157_v31 = vpop.f32.mrf.mxu1  ;;  %v428_v21 = vld [vmem:[#allocation2 + $0x160] sm:$0xff] }
 0x14d   : > { %v1419_v25 = vld [vmem:[#allocation2 + $0x130] sm:$0xff]  ;;  %1912 = vst.msk [vmem:[%s3032_s6 + $0x10] sm:$0xf] %vm1907_vm1, %v2275_v16  ;;  %v1592_v26 = vmax.f32 %v1528_v18, 0.0  ;;  %v1458_v28 = vmul.f32 %v3009_v36, %v1387_v24  ;;  %v1258_v32 = vadd.f32 %v1029_v30, %v393_v22  ;;  %v1290_v33 = vadd.f32 %v1157_v31, %v425_v23 }
 0x14e   : > { %1944 = vst.msk [vmem:[%s3032_s6 + $0x90] sm:$0xf] %vm1907_vm1, %v2307_v17  ;;  %v1624_v27 = vmax.f32 %v1560_v19, 0.0  ;;  %v1490_v29 = vmul.f32 %v3009_v36, %v1419_v25  ;;  %v1031_v43 = vpop.f32.mrf.mxu0  ;;  %v1159_v44 = vpop.f32.mrf.mxu1 }
 0x14f   : > { %v2276_v35 = vpack.c.bf16 %v1592_v26, %v1592_v26  ;;  %v1529_v38 = vadd.f32 %v3016_v39, %v1458_v28  ;;  %1323 = vst.msk [vmem:[#allocation2 + $0x48] sm:$0xff] %vm319_vm0, %v1258_v32  ;;  %1355 = vst.msk [vmem:[#allocation2 + $0x148] sm:$0xff] %vm319_vm0, %v1290_v33 }
 0x150   : > { %v2308_v37 = vpack.c.bf16 %v1624_v27, %v1624_v27  ;;  %v1561_v40 = vadd.f32 %v3016_v39, %v1490_v29  ;;  %v1388_v41 = vld [vmem:[#allocation2 + $0x38] sm:$0xff]  ;;  %v1034_v50 = vpop.f32.mrf.mxu0  ;;  %v1162_v51 = vpop.f32.mrf.mxu1 }
 0x151   : > { %v1420_v42 = vld [vmem:[#allocation2 + $0x138] sm:$0xff]  ;;  %v1459_v46 = vmul.f32 %v3009_v36, %v1388_v41  ;;  %1913 = vst.msk [vmem:[%s3032_s6 + $0x14] sm:$0xf] %vm1907_vm1, %v2276_v35  ;;  %v1593_v48 = vmax.f32 %v1529_v38, 0.0  ;;  %v1259_v54 = vadd.f32 %v1034_v50, %v394_v34  ;;  %v1291_v55 = vadd.f32 %v1162_v51, %v426_v45  ;;  %v429_v41 = vld [vmem:[#allocation2 + $0x168] sm:$0xff] }
 0x152   : > { %v1491_v47 = vmul.f32 %v3009_v36, %v1420_v42  ;;  %1945 = vst.msk [vmem:[%s3032_s6 + $0x94] sm:$0xf] %vm1907_vm1, %v2308_v37  ;;  %v1625_v49 = vmax.f32 %v1561_v40, 0.0  ;;  %v1389_v58 = vld [vmem:[#allocation2 + $0x40] sm:$0xff]  ;;  %v1036_v60 = vpop.f32.mrf.mxu0  ;;  %v1164_v61 = vpop.f32.mrf.mxu1  ;;  %v397_v40 = vld [vmem:[#allocation2 + $0x68] sm:$0xff] }
 0x153   : > { %v1530_v52 = vadd.f32 %v3016_v39, %v1459_v46  ;;  %v2277_v56 = vpack.c.bf16 %v1593_v48, %v1593_v48  ;;  %v1421_v59 = vld [vmem:[#allocation2 + $0x140] sm:$0xff]  ;;  %v1460_v0 = vmul.f32 %v3009_v36, %v1389_v58  ;;  %1324 = vst.msk [vmem:[#allocation2 + $0x50] sm:$0xff] %vm319_vm0, %v1259_v54  ;;  %1356 = vst.msk [vmem:[#allocation2 + $0x150] sm:$0xff] %vm319_vm0, %v1291_v55 }
 0x154   : > { %v1562_v53 = vadd.f32 %v3016_v39, %v1491_v47  ;;  %v2309_v57 = vpack.c.bf16 %v1625_v49, %v1625_v49  ;;  %v1492_v1 = vmul.f32 %v3009_v36, %v1421_v59  ;;  %v1037_v4 = vpop.f32.mrf.mxu0  ;;  %v1165_v5 = vpop.f32.mrf.mxu1 }
 0x155   : > { %v1594_v62 = vmax.f32 %v1530_v52, 0.0  ;;  %1914 = vst.msk [vmem:[%s3032_s6 + $0x18] sm:$0xf] %vm1907_vm1, %v2277_v56  ;;  %v1531_v8 = vadd.f32 %v3016_v39, %v1460_v0  ;;  %v1260_v12 = vadd.f32 %v1037_v4, %v395_v2  ;;  %v1292_v13 = vadd.f32 %v1165_v5, %v427_v3  ;;  %v398_v52 = vld [vmem:[#allocation2 + $0x70] sm:$0xff] }
 0x156   : > { %v1626_v63 = vmax.f32 %v1562_v53, 0.0  ;;  %1946 = vst.msk [vmem:[%s3032_s6 + $0x98] sm:$0xf] %vm1907_vm1, %v2309_v57  ;;  %v1563_v9 = vadd.f32 %v3016_v39, %v1492_v1  ;;  %v1390_v10 = vld [vmem:[#allocation2 + $0x48] sm:$0xff]  ;;  %v1039_v14 = vpop.f32.mrf.mxu0  ;;  %v1167_v15 = vpop.f32.mrf.mxu1  ;;  %v430_v53 = vld [vmem:[#allocation2 + $0x170] sm:$0xff] }
 0x157   : > { %v2278_v6 = vpack.c.bf16 %v1594_v62, %v1594_v62  ;;  %v1422_v11 = vld [vmem:[#allocation2 + $0x148] sm:$0xff]  ;;  %v1595_v16 = vmax.f32 %v1531_v8, 0.0  ;;  %v1461_v18 = vmul.f32 %v3009_v36, %v1390_v10  ;;  %1325 = vst.msk [vmem:[#allocation2 + $0x58] sm:$0xff] %vm319_vm0, %v1260_v12  ;;  %1357 = vst.msk [vmem:[#allocation2 + $0x158] sm:$0xff] %vm319_vm0, %v1292_v13 }
 0x158   : > { %v2310_v7 = vpack.c.bf16 %v1626_v63, %v1626_v63  ;;  %v1627_v17 = vmax.f32 %v1563_v9, 0.0  ;;  %v1493_v19 = vmul.f32 %v3009_v36, %v1422_v11  ;;  %v1042_v22 = vpop.f32.mrf.mxu0  ;;  %v1170_v23 = vpop.f32.mrf.mxu1 }
 0x159   : > { %1915 = vst.msk [vmem:[%s3032_s6 + $0x1c] sm:$0xf] %vm1907_vm1, %v2278_v6  ;;  %v2279_v24 = vpack.c.bf16 %v1595_v16, %v1595_v16  ;;  %v1532_v26 = vadd.f32 %v3016_v39, %v1461_v18  ;;  %v1261_v30 = vadd.f32 %v1042_v22, %v396_v20  ;;  %v1293_v31 = vadd.f32 %v1170_v23, %v428_v21  ;;  %v399_v6 = vld [vmem:[#allocation2 + $0x78] sm:$0xff] }
 0x15a   : > { %1947 = vst.msk [vmem:[%s3032_s6 + $0x9c] sm:$0xf] %vm1907_vm1, %v2310_v7  ;;  %v2311_v25 = vpack.c.bf16 %v1627_v17, %v1627_v17  ;;  %v1564_v27 = vadd.f32 %v3016_v39, %v1493_v19  ;;  %v1391_v28 = vld [vmem:[#allocation2 + $0x50] sm:$0xff]  ;;  %v1044_v32 = vpop.f32.mrf.mxu0  ;;  %v1172_v33 = vpop.f32.mrf.mxu1  ;;  %v431_v7 = vld [vmem:[#allocation2 + $0x178] sm:$0xff] }
 0x15b   : > { %v1423_v29 = vld [vmem:[#allocation2 + $0x150] sm:$0xff]  ;;  %1916 = vst.msk [vmem:[%s3032_s6 + $0x20] sm:$0xf] %vm1907_vm1, %v2279_v24  ;;  %v1596_v34 = vmax.f32 %v1532_v26, 0.0  ;;  %v1462_v37 = vmul.f32 %v3009_v36, %v1391_v28  ;;  %v400_v24 = vld [vmem:[#allocation2 + $0x80] sm:$0xff] }
 0x15c   : > { %1948 = vst.msk [vmem:[%s3032_s6 + $0xa0] sm:$0xf] %vm1907_vm1, %v2311_v25  ;;  %v1628_v35 = vmax.f32 %v1564_v27, 0.0  ;;  %v1494_v38 = vmul.f32 %v3009_v36, %v1423_v29  ;;  %v1045_v42 = vpop.f32.mrf.mxu0  ;;  %v1173_v43 = vpop.f32.mrf.mxu1  ;;  %v432_v25 = vld [vmem:[#allocation2 + $0x180] sm:$0xff] }
 0x15d   : > { %1326 = vst.msk [vmem:[#allocation2 + $0x60] sm:$0xff] %vm319_vm0, %v1261_v30  ;;  %1358 = vst.msk [vmem:[#allocation2 + $0x160] sm:$0xff] %vm319_vm0, %v1293_v31  ;;  %v2280_v44 = vpack.c.bf16 %v1596_v34, %v1596_v34  ;;  %v1533_v46 = vadd.f32 %v3016_v39, %v1462_v37  ;;  %v1262_v48 = vadd.f32 %v1045_v42, %v397_v40  ;;  %v401_v37 = vld [vmem:[#allocation2 + $0x88] sm:$0xff] }
 0x15e   : > { %v2312_v45 = vpack.c.bf16 %v1628_v35, %v1628_v35  ;;  %v1565_v47 = vadd.f32 %v3016_v39, %v1494_v38  ;;  %v1294_v49 = vadd.f32 %v1173_v43, %v429_v41  ;;  %v1047_v50 = vpop.f32.mrf.mxu0  ;;  %v1175_v51 = vpop.f32.mrf.mxu1  ;;  %v1392_v56 = vld [vmem:[#allocation2 + $0x58] sm:$0xff] }
 0x15f   : > { %1917 = vst.msk [vmem:[%s3032_s6 + $0x24] sm:$0xf] %vm1907_vm1, %v2280_v44  ;;  %v1597_v54 = vmax.f32 %v1533_v46, 0.0  ;;  %v1424_v57 = vld [vmem:[#allocation2 + $0x158] sm:$0xff]  ;;  %v1463_v58 = vmul.f32 %v3009_v36, %v1392_v56 }
 0x160   : > { %1949 = vst.msk [vmem:[%s3032_s6 + $0xa4] sm:$0xf] %vm1907_vm1, %v2312_v45  ;;  %v1629_v55 = vmax.f32 %v1565_v47, 0.0  ;;  %v1495_v59 = vmul.f32 %v3009_v36, %v1424_v57  ;;  %v1050_v60 = vpop.f32.mrf.mxu0  ;;  %v1178_v61 = vpop.f32.mrf.mxu1  ;;  %v433_v47 = vld [vmem:[#allocation2 + $0x188] sm:$0xff] }
 0x161   : > { %1327 = vst.msk [vmem:[#allocation2 + $0x68] sm:$0xff] %vm319_vm0, %v1262_v48  ;;  %1359 = vst.msk [vmem:[#allocation2 + $0x168] sm:$0xff] %vm319_vm0, %v1294_v49  ;;  %v2281_v62 = vpack.c.bf16 %v1597_v54, %v1597_v54  ;;  %v1263_v0 = vadd.f32 %v1050_v60, %v398_v52  ;;  %v1295_v1 = vadd.f32 %v1178_v61, %v430_v53 }
 0x162   : > { %v2313_v63 = vpack.c.bf16 %v1629_v55, %v1629_v55  ;;  %v1534_v2 = vadd.f32 %v3016_v39, %v1463_v58  ;;  %v1566_v3 = vadd.f32 %v3016_v39, %v1495_v59  ;;  %v1052_v4 = vpop.f32.mrf.mxu0  ;;  %v1180_v5 = vpop.f32.mrf.mxu1 }
 0x163   : > { %1918 = vst.msk [vmem:[%s3032_s6 + $0x28] sm:$0xf] %vm1907_vm1, %v2281_v62  ;;  %v402_v4 = vld [vmem:[#allocation2 + $0x90] sm:$0xff] }
 0x164   : > { %1950 = vst.msk [vmem:[%s3032_s6 + $0xa8] sm:$0xf] %vm1907_vm1, %v2313_v63  ;;  %v1393_v8 = vld [vmem:[#allocation2 + $0x60] sm:$0xff]  ;;  %v1598_v10 = vmax.f32 %v1534_v2, 0.0  ;;  %v1630_v11 = vmax.f32 %v1566_v3, 0.0  ;;  %v1053_v14 = vpop.f32.mrf.mxu0  ;;  %v1181_v15 = vpop.f32.mrf.mxu1  ;;  %v434_v5 = vld [vmem:[#allocation2 + $0x190] sm:$0xff] }
 0x165   : > { %v1425_v9 = vld [vmem:[#allocation2 + $0x160] sm:$0xff]  ;;  %1328 = vst.msk [vmem:[#allocation2 + $0x70] sm:$0xff] %vm319_vm0, %v1263_v0  ;;  %1360 = vst.msk [vmem:[#allocation2 + $0x170] sm:$0xff] %vm319_vm0, %v1295_v1  ;;  %v1464_v12 = vmul.f32 %v3009_v36, %v1393_v8  ;;  %v1264_v16 = vadd.f32 %v1053_v14, %v399_v6  ;;  %v1296_v17 = vadd.f32 %v1181_v15, %v431_v7 }
 0x166   : > { %v1496_v13 = vmul.f32 %v3009_v36, %v1425_v9  ;;  %v2282_v18 = vpack.c.bf16 %v1598_v10, %v1598_v10  ;;  %v2314_v19 = vpack.c.bf16 %v1630_v11, %v1630_v11  ;;  %v1055_v22 = vpop.f32.mrf.mxu0  ;;  %v1183_v23 = vpop.f32.mrf.mxu1 }
 0x167   : > { %v1535_v20 = vadd.f32 %v3016_v39, %v1464_v12  ;;  %1329 = vst.msk [vmem:[#allocation2 + $0x78] sm:$0xff] %vm319_vm0, %v1264_v16  ;;  %1361 = vst.msk [vmem:[#allocation2 + $0x178] sm:$0xff] %vm319_vm0, %v1296_v17  ;;  %v403_v22 = vld [vmem:[#allocation2 + $0x98] sm:$0xff] }
 0x168   : > { %v1567_v21 = vadd.f32 %v3016_v39, %v1496_v13  ;;  %v1394_v26 = vld [vmem:[#allocation2 + $0x68] sm:$0xff]  ;;  %1919 = vst.msk [vmem:[%s3032_s6 + $0x2c] sm:$0xf] %vm1907_vm1, %v2282_v18  ;;  %1951 = vst.msk [vmem:[%s3032_s6 + $0xac] sm:$0xf] %vm1907_vm1, %v2314_v19  ;;  %v1058_v32 = vpop.f32.mrf.mxu0  ;;  %v1186_v33 = vpop.f32.mrf.mxu1  ;;  %v435_v23 = vld [vmem:[#allocation2 + $0x198] sm:$0xff] }
 0x169   : > { %v1426_v27 = vld [vmem:[#allocation2 + $0x168] sm:$0xff]  ;;  %v1599_v28 = vmax.f32 %v1535_v20, 0.0  ;;  %v1465_v30 = vmul.f32 %v3009_v36, %v1394_v26  ;;  %v1265_v34 = vadd.f32 %v1058_v32, %v400_v24  ;;  %v1297_v35 = vadd.f32 %v1186_v33, %v432_v25 }
 0x16a   : > { %v1631_v29 = vmax.f32 %v1567_v21, 0.0  ;;  %v1497_v31 = vmul.f32 %v3009_v36, %v1426_v27  ;;  %v1060_v45 = vpop.f32.mrf.mxu0  ;;  %v1188_v46 = vpop.f32.mrf.mxu1 }
 0x16b   : > { %v2283_v38 = vpack.c.bf16 %v1599_v28, %v1599_v28  ;;  %v1536_v41 = vadd.f32 %v3016_v39, %v1465_v30  ;;  %1330 = vst.msk [vmem:[#allocation2 + $0x80] sm:$0xff] %vm319_vm0, %v1265_v34  ;;  %1362 = vst.msk [vmem:[#allocation2 + $0x180] sm:$0xff] %vm319_vm0, %v1297_v35 }
 0x16c   : > { %v2315_v40 = vpack.c.bf16 %v1631_v29, %v1631_v29  ;;  %v1568_v42 = vadd.f32 %v3016_v39, %v1497_v31  ;;  %v1395_v43 = vld [vmem:[#allocation2 + $0x70] sm:$0xff]  ;;  %v1061_v52 = vpop.f32.mrf.mxu0  ;;  %v1189_v53 = vpop.f32.mrf.mxu1 }
 0x16d   : > { %v1427_v44 = vld [vmem:[#allocation2 + $0x170] sm:$0xff]  ;;  %v1466_v48 = vmul.f32 %v3009_v36, %v1395_v43  ;;  %1920 = vst.msk [vmem:[%s3032_s6 + $0x30] sm:$0xf] %vm1907_vm1, %v2283_v38  ;;  %v1600_v50 = vmax.f32 %v1536_v41, 0.0  ;;  %v1266_v56 = vadd.f32 %v1061_v52, %v401_v37  ;;  %v1298_v57 = vadd.f32 %v1189_v53, %v433_v47  ;;  %v436_v43 = vld [vmem:[#allocation2 + $0x1a0] sm:$0xff] }
 0x16e   : > { %v1498_v49 = vmul.f32 %v3009_v36, %v1427_v44  ;;  %1952 = vst.msk [vmem:[%s3032_s6 + $0xb0] sm:$0xf] %vm1907_vm1, %v2315_v40  ;;  %v1632_v51 = vmax.f32 %v1568_v42, 0.0  ;;  %v1396_v60 = vld [vmem:[#allocation2 + $0x78] sm:$0xff]  ;;  %v1063_v62 = vpop.f32.mrf.mxu0  ;;  %v1191_v63 = vpop.f32.mrf.mxu1  ;;  %v404_v42 = vld [vmem:[#allocation2 + $0xa0] sm:$0xff] }
 0x16f   : > { %v1537_v54 = vadd.f32 %v3016_v39, %v1466_v48  ;;  %v2284_v58 = vpack.c.bf16 %v1600_v50, %v1600_v50  ;;  %v1428_v61 = vld [vmem:[#allocation2 + $0x178] sm:$0xff]  ;;  %v1467_v2 = vmul.f32 %v3009_v36, %v1396_v60  ;;  %1331 = vst.msk [vmem:[#allocation2 + $0x88] sm:$0xff] %vm319_vm0, %v1266_v56  ;;  %1363 = vst.msk [vmem:[#allocation2 + $0x188] sm:$0xff] %vm319_vm0, %v1298_v57 }
 0x170   : > { %v1569_v55 = vadd.f32 %v3016_v39, %v1498_v49  ;;  %v2316_v59 = vpack.c.bf16 %v1632_v51, %v1632_v51  ;;  %v1499_v3 = vmul.f32 %v3009_v36, %v1428_v61  ;;  %v1066_v6 = vpop.f32.mrf.mxu0  ;;  %v1194_v7 = vpop.f32.mrf.mxu1 }
 0x171   : > { %v1601_v0 = vmax.f32 %v1537_v54, 0.0  ;;  %1921 = vst.msk [vmem:[%s3032_s6 + $0x34] sm:$0xf] %vm1907_vm1, %v2284_v58  ;;  %v1538_v10 = vadd.f32 %v3016_v39, %v1467_v2  ;;  %v1267_v14 = vadd.f32 %v1066_v6, %v402_v4  ;;  %v1299_v15 = vadd.f32 %v1194_v7, %v434_v5  ;;  %v405_v54 = vld [vmem:[#allocation2 + $0xa8] sm:$0xff] }
 0x172   : > { %v1633_v1 = vmax.f32 %v1569_v55, 0.0  ;;  %1953 = vst.msk [vmem:[%s3032_s6 + $0xb4] sm:$0xf] %vm1907_vm1, %v2316_v59  ;;  %v1570_v11 = vadd.f32 %v3016_v39, %v1499_v3  ;;  %v1397_v12 = vld [vmem:[#allocation2 + $0x80] sm:$0xff]  ;;  %v1068_v16 = vpop.f32.mrf.mxu0  ;;  %v1196_v17 = vpop.f32.mrf.mxu1  ;;  %v437_v55 = vld [vmem:[#allocation2 + $0x1a8] sm:$0xff] }
 0x173   : > { %v2285_v8 = vpack.c.bf16 %v1601_v0, %v1601_v0  ;;  %v1429_v13 = vld [vmem:[#allocation2 + $0x180] sm:$0xff]  ;;  %v1602_v18 = vmax.f32 %v1538_v10, 0.0  ;;  %v1468_v20 = vmul.f32 %v3009_v36, %v1397_v12  ;;  %1332 = vst.msk [vmem:[#allocation2 + $0x90] sm:$0xff] %vm319_vm0, %v1267_v14  ;;  %1364 = vst.msk [vmem:[#allocation2 + $0x190] sm:$0xff] %vm319_vm0, %v1299_v15 }
 0x174   : > { %v2317_v9 = vpack.c.bf16 %v1633_v1, %v1633_v1  ;;  %v1634_v19 = vmax.f32 %v1570_v11, 0.0  ;;  %v1500_v21 = vmul.f32 %v3009_v36, %v1429_v13  ;;  %v1069_v24 = vpop.f32.mrf.mxu0  ;;  %v1197_v25 = vpop.f32.mrf.mxu1 }
 0x175   : > { %1922 = vst.msk [vmem:[%s3032_s6 + $0x38] sm:$0xf] %vm1907_vm1, %v2285_v8  ;;  %v2286_v26 = vpack.c.bf16 %v1602_v18, %v1602_v18  ;;  %v1539_v28 = vadd.f32 %v3016_v39, %v1468_v20  ;;  %v1268_v32 = vadd.f32 %v1069_v24, %v403_v22  ;;  %v1300_v33 = vadd.f32 %v1197_v25, %v435_v23  ;;  %v406_v8 = vld [vmem:[#allocation2 + $0xb0] sm:$0xff] }
 0x176   : > { %1954 = vst.msk [vmem:[%s3032_s6 + $0xb8] sm:$0xf] %vm1907_vm1, %v2317_v9  ;;  %v2318_v27 = vpack.c.bf16 %v1634_v19, %v1634_v19  ;;  %v1571_v29 = vadd.f32 %v3016_v39, %v1500_v21  ;;  %v1398_v30 = vld [vmem:[#allocation2 + $0x88] sm:$0xff]  ;;  %v1071_v34 = vpop.f32.mrf.mxu0  ;;  %v1199_v35 = vpop.f32.mrf.mxu1  ;;  %v438_v9 = vld [vmem:[#allocation2 + $0x1b0] sm:$0xff] }
 0x177   : > { %v1430_v31 = vld [vmem:[#allocation2 + $0x188] sm:$0xff]  ;;  %1923 = vst.msk [vmem:[%s3032_s6 + $0x3c] sm:$0xf] %vm1907_vm1, %v2286_v26  ;;  %v1603_v37 = vmax.f32 %v1539_v28, 0.0  ;;  %v1469_v40 = vmul.f32 %v3009_v36, %v1398_v30  ;;  %v407_v26 = vld [vmem:[#allocation2 + $0xb8] sm:$0xff] }
 0x178   : > { %1955 = vst.msk [vmem:[%s3032_s6 + $0xbc] sm:$0xf] %vm1907_vm1, %v2318_v27  ;;  %v1635_v38 = vmax.f32 %v1571_v29, 0.0  ;;  %v1501_v41 = vmul.f32 %v3009_v36, %v1430_v31  ;;  %v1074_v44 = vpop.f32.mrf.mxu0  ;;  %v1202_v45 = vpop.f32.mrf.mxu1  ;;  %v439_v27 = vld [vmem:[#allocation2 + $0x1b8] sm:$0xff] }
 0x179   : > { %1333 = vst.msk [vmem:[#allocation2 + $0x98] sm:$0xff] %vm319_vm0, %v1268_v32  ;;  %1365 = vst.msk [vmem:[#allocation2 + $0x198] sm:$0xff] %vm319_vm0, %v1300_v33  ;;  %v2287_v46 = vpack.c.bf16 %v1603_v37, %v1603_v37  ;;  %v1540_v48 = vadd.f32 %v3016_v39, %v1469_v40  ;;  %v1269_v50 = vadd.f32 %v1074_v44, %v404_v42  ;;  %v408_v40 = vld [vmem:[#allocation2 + $0xc0] sm:$0xff] }
 0x17a   : > { %v2319_v47 = vpack.c.bf16 %v1635_v38, %v1635_v38  ;;  %v1572_v49 = vadd.f32 %v3016_v39, %v1501_v41  ;;  %v1301_v51 = vadd.f32 %v1202_v45, %v436_v43  ;;  %v1076_v52 = vpop.f32.mrf.mxu0  ;;  %v1204_v53 = vpop.f32.mrf.mxu1  ;;  %v1399_v58 = vld [vmem:[#allocation2 + $0x90] sm:$0xff] }
 0x17b   : > { %1924 = vst.msk [vmem:[%s3032_s6 + $0x40] sm:$0xf] %vm1907_vm1, %v2287_v46  ;;  %v1604_v56 = vmax.f32 %v1540_v48, 0.0  ;;  %v1431_v59 = vld [vmem:[#allocation2 + $0x190] sm:$0xff]  ;;  %v1470_v60 = vmul.f32 %v3009_v36, %v1399_v58 }
 0x17c   : > { %1956 = vst.msk [vmem:[%s3032_s6 + $0xc0] sm:$0xf] %vm1907_vm1, %v2319_v47  ;;  %v1636_v57 = vmax.f32 %v1572_v49, 0.0  ;;  %v1502_v61 = vmul.f32 %v3009_v36, %v1431_v59  ;;  %v1077_v62 = vpop.f32.mrf.mxu0  ;;  %v1205_v63 = vpop.f32.mrf.mxu1  ;;  %v440_v49 = vld [vmem:[#allocation2 + $0x1c0] sm:$0xff] }
 0x17d   : > { %1334 = vst.msk [vmem:[#allocation2 + $0xa0] sm:$0xff] %vm319_vm0, %v1269_v50  ;;  %1366 = vst.msk [vmem:[#allocation2 + $0x1a0] sm:$0xff] %vm319_vm0, %v1301_v51  ;;  %v2288_v0 = vpack.c.bf16 %v1604_v56, %v1604_v56  ;;  %v1270_v2 = vadd.f32 %v1077_v62, %v405_v54  ;;  %v1302_v3 = vadd.f32 %v1205_v63, %v437_v55 }
 0x17e   : > { %v2320_v1 = vpack.c.bf16 %v1636_v57, %v1636_v57  ;;  %v1541_v4 = vadd.f32 %v3016_v39, %v1470_v60  ;;  %v1573_v5 = vadd.f32 %v3016_v39, %v1502_v61  ;;  %v1079_v6 = vpop.f32.mrf.mxu0  ;;  %v1207_v7 = vpop.f32.mrf.mxu1 }
 0x17f   : > { %1925 = vst.msk [vmem:[%s3032_s6 + $0x44] sm:$0xf] %vm1907_vm1, %v2288_v0  ;;  %v409_v6 = vld [vmem:[#allocation2 + $0xc8] sm:$0xff] }
 0x180   : > { %1957 = vst.msk [vmem:[%s3032_s6 + $0xc4] sm:$0xf] %vm1907_vm1, %v2320_v1  ;;  %v1400_v10 = vld [vmem:[#allocation2 + $0x98] sm:$0xff]  ;;  %v1605_v12 = vmax.f32 %v1541_v4, 0.0  ;;  %v1637_v13 = vmax.f32 %v1573_v5, 0.0  ;;  %v1082_v16 = vpop.f32.mrf.mxu0  ;;  %v1210_v17 = vpop.f32.mrf.mxu1  ;;  %v441_v7 = vld [vmem:[#allocation2 + $0x1c8] sm:$0xff] }
 0x181   : > { %v1432_v11 = vld [vmem:[#allocation2 + $0x198] sm:$0xff]  ;;  %1335 = vst.msk [vmem:[#allocation2 + $0xa8] sm:$0xff] %vm319_vm0, %v1270_v2  ;;  %1367 = vst.msk [vmem:[#allocation2 + $0x1a8] sm:$0xff] %vm319_vm0, %v1302_v3  ;;  %v1471_v14 = vmul.f32 %v3009_v36, %v1400_v10  ;;  %v1271_v18 = vadd.f32 %v1082_v16, %v406_v8  ;;  %v1303_v19 = vadd.f32 %v1210_v17, %v438_v9 }
 0x182   : > { %v1503_v15 = vmul.f32 %v3009_v36, %v1432_v11  ;;  %v2289_v20 = vpack.c.bf16 %v1605_v12, %v1605_v12  ;;  %v2321_v21 = vpack.c.bf16 %v1637_v13, %v1637_v13  ;;  %v1084_v24 = vpop.f32.mrf.mxu0  ;;  %v1212_v25 = vpop.f32.mrf.mxu1 }
 0x183   : > { %v1542_v22 = vadd.f32 %v3016_v39, %v1471_v14  ;;  %1336 = vst.msk [vmem:[#allocation2 + $0xb0] sm:$0xff] %vm319_vm0, %v1271_v18  ;;  %1368 = vst.msk [vmem:[#allocation2 + $0x1b0] sm:$0xff] %vm319_vm0, %v1303_v19  ;;  %v442_v24 = vld [vmem:[#allocation2 + $0x1d0] sm:$0xff] }
 0x184   : > { %v1574_v23 = vadd.f32 %v3016_v39, %v1503_v15  ;;  %v1401_v28 = vld [vmem:[#allocation2 + $0xa0] sm:$0xff]  ;;  %1926 = vst.msk [vmem:[%s3032_s6 + $0x48] sm:$0xf] %vm1907_vm1, %v2289_v20  ;;  %1958 = vst.msk [vmem:[%s3032_s6 + $0xc8] sm:$0xf] %vm1907_vm1, %v2321_v21  ;;  %v1085_v34 = vpop.f32.mrf.mxu0  ;;  %v1213_v35 = vpop.f32.mrf.mxu1 }
 0x185   : > { %v1433_v29 = vld [vmem:[#allocation2 + $0x1a0] sm:$0xff]  ;;  %v1606_v30 = vmax.f32 %v1542_v22, 0.0  ;;  %v1472_v32 = vmul.f32 %v3009_v36, %v1401_v28  ;;  %v1272_v37 = vadd.f32 %v1085_v34, %v407_v26  ;;  %v1304_v38 = vadd.f32 %v1213_v35, %v439_v27 }
 0x186   : > { %v1638_v31 = vmax.f32 %v1574_v23, 0.0  ;;  %v1504_v33 = vmul.f32 %v3009_v36, %v1433_v29  ;;  %v1087_v47 = vpop.f32.mrf.mxu0  ;;  %v1215_v48 = vpop.f32.mrf.mxu1  ;;  %v3253_v21 = vld [vmem:[%s3370_s2] ss:$0 sm:$0xff]  ;;  %v410_v23 = vld [vmem:[#allocation2 + $0xd0] sm:$0xff] }
 0x187   : > { %v2290_v41 = vpack.c.bf16 %v1606_v30, %v1606_v30  ;;  %v1543_v43 = vadd.f32 %v3016_v39, %v1472_v32  ;;  %1337 = vst.msk [vmem:[#allocation2 + $0xb8] sm:$0xff] %vm319_vm0, %v1272_v37  ;;  %1369 = vst.msk [vmem:[#allocation2 + $0x1b8] sm:$0xff] %vm319_vm0, %v1304_v38  ;;  %v3262_v29 = vld [vmem:[%s3371_s3] ss:$0 sm:$0xff] }
 0x188   : > { %v2322_v42 = vpack.c.bf16 %v1638_v31, %v1638_v31  ;;  %v1575_v44 = vadd.f32 %v3016_v39, %v1504_v33  ;;  %v1402_v45 = vld [vmem:[#allocation2 + $0xa8] sm:$0xff]  ;;  %v1090_v54 = vpop.f32.mrf.mxu0  ;;  %v1218_v55 = vpop.f32.mrf.mxu1 }
 0x189   : > { %v1434_v46 = vld [vmem:[#allocation2 + $0x1a8] sm:$0xff]  ;;  %v1473_v50 = vmul.f32 %v3009_v36, %v1402_v45  ;;  %1927 = vst.msk [vmem:[%s3032_s6 + $0x4c] sm:$0xf] %vm1907_vm1, %v2290_v41  ;;  %v1607_v52 = vmax.f32 %v1543_v43, 0.0  ;;  %v1273_v58 = vadd.f32 %v1090_v54, %v408_v40  ;;  %v1305_v59 = vadd.f32 %v1218_v55, %v440_v49  ;;  %v443_v45 = vld [vmem:[#allocation2 + $0x1d8] sm:$0xff] }
 0x18a   : > { %v1505_v51 = vmul.f32 %v3009_v36, %v1434_v46  ;;  %1959 = vst.msk [vmem:[%s3032_s6 + $0xcc] sm:$0xf] %vm1907_vm1, %v2322_v42  ;;  %v1639_v53 = vmax.f32 %v1575_v44, 0.0  ;;  %v1403_v62 = vld [vmem:[#allocation2 + $0xb0] sm:$0xff]  ;;  %v1092_v0 = vpop.f32.mrf.mxu0  ;;  %v1220_v1 = vpop.f32.mrf.mxu1  ;;  %v411_v44 = vld [vmem:[#allocation2 + $0xd8] sm:$0xff] }
 0x18b   : > { %v1544_v56 = vadd.f32 %v3016_v39, %v1473_v50  ;;  %v2291_v60 = vpack.c.bf16 %v1607_v52, %v1607_v52  ;;  %v1435_v63 = vld [vmem:[#allocation2 + $0x1b0] sm:$0xff]  ;;  %v1474_v4 = vmul.f32 %v3009_v36, %v1403_v62  ;;  %1338 = vst.msk [vmem:[#allocation2 + $0xc0] sm:$0xff] %vm319_vm0, %v1273_v58  ;;  %1370 = vst.msk [vmem:[#allocation2 + $0x1c0] sm:$0xff] %vm319_vm0, %v1305_v59 }
 0x18c   : > { %v1576_v57 = vadd.f32 %v3016_v39, %v1505_v51  ;;  %v2323_v61 = vpack.c.bf16 %v1639_v53, %v1639_v53  ;;  %v1506_v5 = vmul.f32 %v3009_v36, %v1435_v63  ;;  %v1093_v8 = vpop.f32.mrf.mxu0  ;;  %v1221_v9 = vpop.f32.mrf.mxu1 }
 0x18d   : > { %v1608_v2 = vmax.f32 %v1544_v56, 0.0  ;;  %1928 = vst.msk [vmem:[%s3032_s6 + $0x50] sm:$0xf] %vm1907_vm1, %v2291_v60  ;;  %v1545_v12 = vadd.f32 %v3016_v39, %v1474_v4  ;;  %v1274_v15 = vadd.f32 %v1093_v8, %v409_v6  ;;  %v1306_v16 = vadd.f32 %v1221_v9, %v441_v7  ;;  %v412_v56 = vld [vmem:[#allocation2 + $0xe0] sm:$0xff] }
 0x18e   : > { %v1640_v3 = vmax.f32 %v1576_v57, 0.0  ;;  %1960 = vst.msk [vmem:[%s3032_s6 + $0xd0] sm:$0xf] %vm1907_vm1, %v2323_v61  ;;  %v1577_v36 = vadd.f32 %v3016_v39, %v1506_v5  ;;  %v1404_v13 = vld [vmem:[#allocation2 + $0xb8] sm:$0xff]  ;;  %v1095_v17 = vpop.f32.mrf.mxu0  ;;  %v1223_v18 = vpop.f32.mrf.mxu1  ;;  %v444_v57 = vld [vmem:[#allocation2 + $0x1e0] sm:$0xff] }
 0x18f   : > { %v2292_v10 = vpack.c.bf16 %v1608_v2, %v1608_v2  ;;  %v1436_v14 = vld [vmem:[#allocation2 + $0x1b8] sm:$0xff]  ;;  %v1609_v19 = vmax.f32 %v1545_v12, 0.0  ;;  %v1475_v22 = vmul.f32 %v3253_v21, %v1404_v13  ;;  %1339 = vst.msk [vmem:[#allocation2 + $0xc8] sm:$0xff] %vm319_vm0, %v1274_v15  ;;  %1371 = vst.msk [vmem:[#allocation2 + $0x1c8] sm:$0xff] %vm319_vm0, %v1306_v16 }
 0x190   : > { %v2324_v11 = vpack.c.bf16 %v1640_v3, %v1640_v3  ;;  %v1641_v20 = vmax.f32 %v1577_v36, 0.0  ;;  %v1507_v39 = vmul.f32 %v3253_v21, %v1436_v14  ;;  %v1098_v25 = vpop.f32.mrf.mxu0  ;;  %v1226_v26 = vpop.f32.mrf.mxu1 }
 0x191   : > { %1929 = vst.msk [vmem:[%s3032_s6 + $0x54] sm:$0xf] %vm1907_vm1, %v2292_v10  ;;  %v2293_v27 = vpack.c.bf16 %v1609_v19, %v1609_v19  ;;  %v1546_v30 = vadd.f32 %v3262_v29, %v1475_v22  ;;  %v1275_v34 = vadd.f32 %v1098_v25, %v410_v23  ;;  %v1307_v35 = vadd.f32 %v1226_v26, %v442_v24  ;;  %v413_v10 = vld [vmem:[#allocation2 + $0xe8] sm:$0xff] }
 0x192   : > { %1961 = vst.msk [vmem:[%s3032_s6 + $0xd4] sm:$0xf] %vm1907_vm1, %v2324_v11  ;;  %v2325_v28 = vpack.c.bf16 %v1641_v20, %v1641_v20  ;;  %v1578_v31 = vadd.f32 %v3262_v29, %v1507_v39  ;;  %v1405_v32 = vld [vmem:[#allocation2 + $0xc0] sm:$0xff]  ;;  %v1100_v37 = vpop.f32.mrf.mxu0  ;;  %v1228_v38 = vpop.f32.mrf.mxu1  ;;  %v445_v11 = vld [vmem:[#allocation2 + $0x1e8] sm:$0xff] }
 0x193   : > { %v1437_v33 = vld [vmem:[#allocation2 + $0x1c0] sm:$0xff]  ;;  %1930 = vst.msk [vmem:[%s3032_s6 + $0x58] sm:$0xf] %vm1907_vm1, %v2293_v27  ;;  %v1610_v40 = vmax.f32 %v1546_v30, 0.0  ;;  %v1476_v42 = vmul.f32 %v3253_v21, %v1405_v32  ;;  %v414_v27 = vld [vmem:[#allocation2 + $0xf0] sm:$0xff] }
 0x194   : > { %1962 = vst.msk [vmem:[%s3032_s6 + $0xd8] sm:$0xf] %vm1907_vm1, %v2325_v28  ;;  %v1642_v41 = vmax.f32 %v1578_v31, 0.0  ;;  %v1508_v43 = vmul.f32 %v3253_v21, %v1437_v33  ;;  %v1101_v46 = vpop.f32.mrf.mxu0  ;;  %v1229_v47 = vpop.f32.mrf.mxu1  ;;  %v446_v28 = vld [vmem:[#allocation2 + $0x1f0] sm:$0xff] }
 0x195   : > { %1340 = vst.msk [vmem:[#allocation2 + $0xd0] sm:$0xff] %vm319_vm0, %v1275_v34  ;;  %1372 = vst.msk [vmem:[#allocation2 + $0x1d0] sm:$0xff] %vm319_vm0, %v1307_v35  ;;  %v2294_v48 = vpack.c.bf16 %v1610_v40, %v1610_v40  ;;  %v1547_v50 = vadd.f32 %v3262_v29, %v1476_v42  ;;  %v1276_v52 = vadd.f32 %v1101_v46, %v411_v44  ;;  %v415_v42 = vld [vmem:[#allocation2 + $0xf8] sm:$0xff] }
 0x196   : > { %v2326_v49 = vpack.c.bf16 %v1642_v41, %v1642_v41  ;;  %v1579_v51 = vadd.f32 %v3262_v29, %v1508_v43  ;;  %v1308_v53 = vadd.f32 %v1229_v47, %v443_v45  ;;  %v1103_v54 = vpop.f32.mrf.mxu0  ;;  %v1231_v55 = vpop.f32.mrf.mxu1  ;;  %v1406_v60 = vld [vmem:[#allocation2 + $0xc8] sm:$0xff] }
 0x197   : > { %1931 = vst.msk [vmem:[%s3032_s6 + $0x5c] sm:$0xf] %vm1907_vm1, %v2294_v48  ;;  %v1611_v58 = vmax.f32 %v1547_v50, 0.0  ;;  %v1438_v61 = vld [vmem:[#allocation2 + $0x1c8] sm:$0xff]  ;;  %v1477_v62 = vmul.f32 %v3253_v21, %v1406_v60 }
 0x198   : > { %1963 = vst.msk [vmem:[%s3032_s6 + $0xdc] sm:$0xf] %vm1907_vm1, %v2326_v49  ;;  %v1643_v59 = vmax.f32 %v1579_v51, 0.0  ;;  %v1509_v63 = vmul.f32 %v3253_v21, %v1438_v61  ;;  %v1106_v0 = vpop.f32.mrf.mxu0  ;;  %v1234_v1 = vpop.f32.mrf.mxu1  ;;  %v447_v51 = vld [vmem:[#allocation2 + $0x1f8] sm:$0xff] }
 0x199   : > { %1341 = vst.msk [vmem:[#allocation2 + $0xd8] sm:$0xff] %vm319_vm0, %v1276_v52  ;;  %1373 = vst.msk [vmem:[#allocation2 + $0x1d8] sm:$0xff] %vm319_vm0, %v1308_v53  ;;  %v2295_v2 = vpack.c.bf16 %v1611_v58, %v1611_v58  ;;  %v1277_v4 = vadd.f32 %v1106_v0, %v412_v56  ;;  %v1309_v5 = vadd.f32 %v1234_v1, %v444_v57 }
 0x19a   : > { %v2327_v3 = vpack.c.bf16 %v1643_v59, %v1643_v59  ;;  %v1548_v6 = vadd.f32 %v3262_v29, %v1477_v62  ;;  %v1580_v7 = vadd.f32 %v3262_v29, %v1509_v63  ;;  %v1108_v8 = vpop.f32.mrf.mxu0  ;;  %v1236_v9 = vpop.f32.mrf.mxu1 }
 0x19b   : > { %1932 = vst.msk [vmem:[%s3032_s6 + $0x60] sm:$0xf] %vm1907_vm1, %v2295_v2 }
 0x19c   : > { %1964 = vst.msk [vmem:[%s3032_s6 + $0xe0] sm:$0xf] %vm1907_vm1, %v2327_v3  ;;  %v1407_v12 = vld [vmem:[#allocation2 + $0xd0] sm:$0xff]  ;;  %v1612_v13 = vmax.f32 %v1548_v6, 0.0  ;;  %v1644_v14 = vmax.f32 %v1580_v7, 0.0  ;;  %v1109_v17 = vpop.f32.mrf.mxu0  ;;  %v1237_v18 = vpop.f32.mrf.mxu1 }
 0x19d   : > { %v1439_v36 = vld [vmem:[#allocation2 + $0x1d0] sm:$0xff]  ;;  %1342 = vst.msk [vmem:[#allocation2 + $0xe0] sm:$0xff] %vm319_vm0, %v1277_v4  ;;  %1374 = vst.msk [vmem:[#allocation2 + $0x1e0] sm:$0xff] %vm319_vm0, %v1309_v5  ;;  %v1478_v15 = vmul.f32 %v3253_v21, %v1407_v12  ;;  %v1278_v19 = vadd.f32 %v1109_v17, %v413_v10  ;;  %v1310_v20 = vadd.f32 %v1237_v18, %v445_v11 }
 0x19e   : > { %v1510_v16 = vmul.f32 %v3253_v21, %v1439_v36  ;;  %v2296_v22 = vpack.c.bf16 %v1612_v13, %v1612_v13  ;;  %v2328_v39 = vpack.c.bf16 %v1644_v14, %v1644_v14  ;;  %v1111_v25 = vpop.f32.mrf.mxu0  ;;  %v1239_v26 = vpop.f32.mrf.mxu1 }
 0x19f   : > { %v1549_v23 = vadd.f32 %v3262_v29, %v1478_v15  ;;  %1343 = vst.msk [vmem:[#allocation2 + $0xe8] sm:$0xff] %vm319_vm0, %v1278_v19  ;;  %1375 = vst.msk [vmem:[#allocation2 + $0x1e8] sm:$0xff] %vm319_vm0, %v1310_v20 }
 0x1a0   : > { %v1581_v24 = vadd.f32 %v3262_v29, %v1510_v16  ;;  %v1408_v30 = vld [vmem:[#allocation2 + $0xd8] sm:$0xff]  ;;  %1933 = vst.msk [vmem:[%s3032_s6 + $0x64] sm:$0xf] %vm1907_vm1, %v2296_v22  ;;  %1965 = vst.msk [vmem:[%s3032_s6 + $0xe4] sm:$0xf] %vm1907_vm1, %v2328_v39  ;;  %v1114_v37 = vpop.f32.mrf.mxu0  ;;  %v1242_v38 = vpop.f32.mrf.mxu1 }
 0x1a1   : > { %v1440_v31 = vld [vmem:[#allocation2 + $0x1d8] sm:$0xff]  ;;  %v1613_v32 = vmax.f32 %v1549_v23, 0.0  ;;  %v1479_v34 = vmul.f32 %v3253_v21, %v1408_v30  ;;  %v1279_v40 = vadd.f32 %v1114_v37, %v414_v27  ;;  %v1311_v41 = vadd.f32 %v1242_v38, %v446_v28 }
 0x1a2   : > { %v1645_v33 = vmax.f32 %v1581_v24, 0.0  ;;  %v1511_v35 = vmul.f32 %v3253_v21, %v1440_v31  ;;  %v1116_v49 = vpop.f32.mrf.mxu0  ;;  %v1244_v50 = vpop.f32.mrf.mxu1 }
 0x1a3   : > { %v2297_v43 = vpack.c.bf16 %v1613_v32, %v1613_v32  ;;  %v1550_v45 = vadd.f32 %v3262_v29, %v1479_v34  ;;  %1344 = vst.msk [vmem:[#allocation2 + $0xf0] sm:$0xff] %vm319_vm0, %v1279_v40  ;;  %1376 = vst.msk [vmem:[#allocation2 + $0x1f0] sm:$0xff] %vm319_vm0, %v1311_v41 }
 0x1a4   : > { %v2329_v44 = vpack.c.bf16 %v1645_v33, %v1645_v33  ;;  %v1582_v46 = vadd.f32 %v3262_v29, %v1511_v35  ;;  %v1409_v47 = vld [vmem:[#allocation2 + $0xe0] sm:$0xff]  ;;  %v1117_v56 = vpop.f32.mrf.mxu0  ;;  %v1245_v57 = vpop.f32.mrf.mxu1 }
 0x1a5   : > { %v1441_v48 = vld [vmem:[#allocation2 + $0x1e0] sm:$0xff]  ;;  %v1480_v52 = vmul.f32 %v3253_v21, %v1409_v47  ;;  %1934 = vst.msk [vmem:[%s3032_s6 + $0x68] sm:$0xf] %vm1907_vm1, %v2297_v43  ;;  %v1614_v54 = vmax.f32 %v1550_v45, 0.0  ;;  %v1280_v60 = vadd.f32 %v1117_v56, %v415_v42  ;;  %v1312_v61 = vadd.f32 %v1245_v57, %v447_v51 }
 0x1a6   : > { %v1512_v53 = vmul.f32 %v3253_v21, %v1441_v48  ;;  %1966 = vst.msk [vmem:[%s3032_s6 + $0xe8] sm:$0xf] %vm1907_vm1, %v2329_v44  ;;  %v1646_v55 = vmax.f32 %v1582_v46, 0.0  ;;  %v1410_v0 = vld [vmem:[#allocation2 + $0xe8] sm:$0xff]  ;;  %v1119_v2 = vpop.f32.mrf.mxu0  ;;  %v1247_v3 = vpop.f32.mrf.mxu1 }
 0x1a7   : > { %v1551_v58 = vadd.f32 %v3262_v29, %v1480_v52  ;;  %v2298_v62 = vpack.c.bf16 %v1614_v54, %v1614_v54  ;;  %v1442_v1 = vld [vmem:[#allocation2 + $0x1e8] sm:$0xff]  ;;  %v1481_v6 = vmul.f32 %v3253_v21, %v1410_v0  ;;  %1345 = vst.msk [vmem:[#allocation2 + $0xf8] sm:$0xff] %vm319_vm0, %v1280_v60  ;;  %1377 = vst.msk [vmem:[#allocation2 + $0x1f8] sm:$0xff] %vm319_vm0, %v1312_v61 }
 0x1a8   : > { %v1583_v59 = vadd.f32 %v3262_v29, %v1512_v53  ;;  %v2330_v63 = vpack.c.bf16 %v1646_v55, %v1646_v55  ;;  %v1513_v7 = vmul.f32 %v3253_v21, %v1442_v1 }
 0x1a9   : > { %v1615_v4 = vmax.f32 %v1551_v58, 0.0  ;;  %1935 = vst.msk [vmem:[%s3032_s6 + $0x6c] sm:$0xf] %vm1907_vm1, %v2298_v62  ;;  %v1552_v10 = vadd.f32 %v3262_v29, %v1481_v6 }
 0x1aa   : > { %v1647_v5 = vmax.f32 %v1583_v59, 0.0  ;;  %1967 = vst.msk [vmem:[%s3032_s6 + $0xec] sm:$0xf] %vm1907_vm1, %v2330_v63  ;;  %v1584_v11 = vadd.f32 %v3262_v29, %v1513_v7  ;;  %v1411_v12 = vld [vmem:[#allocation2 + $0xf0] sm:$0xff] }
 0x1ab   : > { %v2299_v8 = vpack.c.bf16 %v1615_v4, %v1615_v4  ;;  %v1443_v36 = vld [vmem:[#allocation2 + $0x1f0] sm:$0xff]  ;;  %v1616_v13 = vmax.f32 %v1552_v10, 0.0  ;;  %v1482_v15 = vmul.f32 %v3253_v21, %v1411_v12 }
 0x1ac   : > { %v2331_v9 = vpack.c.bf16 %v1647_v5, %v1647_v5  ;;  %v1648_v14 = vmax.f32 %v1584_v11, 0.0  ;;  %v1514_v16 = vmul.f32 %v3253_v21, %v1443_v36 }
 0x1ad   : > { %1936 = vst.msk [vmem:[%s3032_s6 + $0x70] sm:$0xf] %vm1907_vm1, %v2299_v8  ;;  %v2300_v17 = vpack.c.bf16 %v1616_v13, %v1616_v13  ;;  %v1553_v19 = vadd.f32 %v3262_v29, %v1482_v15 }
 0x1ae   : > { %1968 = vst.msk [vmem:[%s3032_s6 + $0xf0] sm:$0xf] %vm1907_vm1, %v2331_v9  ;;  %v2332_v18 = vpack.c.bf16 %v1648_v14, %v1648_v14  ;;  %v1585_v20 = vadd.f32 %v3262_v29, %v1514_v16  ;;  %v1412_v22 = vld [vmem:[#allocation2 + $0xf8] sm:$0xff] }
 0x1af   : > { %v1444_v39 = vld [vmem:[#allocation2 + $0x1f8] sm:$0xff]  ;;  %1937 = vst.msk [vmem:[%s3032_s6 + $0x74] sm:$0xf] %vm1907_vm1, %v2300_v17  ;;  %v1617_v23 = vmax.f32 %v1553_v19, 0.0  ;;  %v1483_v25 = vmul.f32 %v3253_v21, %v1412_v22 }
 0x1b0   : > { %1969 = vst.msk [vmem:[%s3032_s6 + $0xf4] sm:$0xf] %vm1907_vm1, %v2332_v18  ;;  %v1649_v24 = vmax.f32 %v1585_v20, 0.0  ;;  %v1515_v26 = vmul.f32 %v3253_v21, %v1444_v39 }
 0x1b1   : > { %v2301_v27 = vpack.c.bf16 %v1617_v23, %v1617_v23  ;;  %v1554_v30 = vadd.f32 %v3262_v29, %v1483_v25 }
 0x1b2   : > { %v2333_v28 = vpack.c.bf16 %v1649_v24, %v1649_v24  ;;  %v1586_v31 = vadd.f32 %v3262_v29, %v1515_v26 }
 0x1b3   : > { %1938 = vst.msk [vmem:[%s3032_s6 + $0x78] sm:$0xf] %vm1907_vm1, %v2301_v27  ;;  %v1618_v32 = vmax.f32 %v1554_v30, 0.0 }
 0x1b4   : > { %1970 = vst.msk [vmem:[%s3032_s6 + $0xf8] sm:$0xf] %vm1907_vm1, %v2333_v28  ;;  %v1650_v33 = vmax.f32 %v1586_v31, 0.0 }
 0x1b5   : > { %v2302_v34 = vpack.c.bf16 %v1618_v32, %v1618_v32 }
 0x1b6   : > { %v2334_v35 = vpack.c.bf16 %v1650_v33, %v1650_v33 }
 0x1b7   : > { %1939 = vst.msk [vmem:[%s3032_s6 + $0x7c] sm:$0xf] %vm1907_vm1, %v2302_v34 }
 0x1b8   : > { %1971 = vst.msk [vmem:[%s3032_s6 + $0xfc] sm:$0xf] %vm1907_vm1, %v2334_v35 }
 0x1b9 PF: > { %s17_s20 = sadd.s32 1, %s2618_s20   ;;  %s3376_s15 = smov %s2602_s16 }
 0x1ba   : > { %p14_p8 = scmp.ge.s32.totalorder %s17_s20, 6   ;;  %s3377_s16 = smov %s2606_s17 }
 0x1bb   : > { %s3378_s17 = smov %s2699_s27  ;;  %s3379_s18 = smov %s2614_s19 }
 0x1bc   : > { %s3380_s19 = smov %s3382_s22  ;;  %16 = sbr.rel (!%p14_p8) target bundleno = 4 (0x4), region = 93 }
 0x1c1   :  { %2000 = vsyncpa [#allocation4], 1 }
 0x1c2   :  { %2002 = vsyncpa [#allocation4 + $0x1], 1 }

</bundles_post_ra>
